<compile_context>
chip_gen: v7x
topology: tpu7x:2x2x1
jax: 0.10.0
libtpu: 0.0.40
codegen_flags: <defaults>
</compile_context>

<pallas_src>
import jax
import jax.numpy as jnp
from jax.experimental import pallas as pl
from jax.experimental.pallas import tpu as pltpu


# -----------------------------------------------------------------------------
# Pallas kernel (single invocation, no grid)
# -----------------------------------------------------------------------------
def predrnn_kernel(x_ref,      # (B*T, D)  flattened batch_first input, row = b*T + t
                   wih0_ref,   # (D, 4H)
                   whh0_ref,   # (H, 4H)
                   b0_ref,     # (1, 4H)
                   wih1_ref,   # (H, 4H)
                   whh1_ref,   # (H, 4H)
                   b1_ref,     # (1, 4H)
                   wfc_ref,    # (H, O)
                   bfc_ref,    # (1, O)
                   out_ref):   # (B, O)
    B = out_ref.shape[0]
    T = x_ref.shape[0] // B
    H = whh0_ref.shape[0]
    G = 4 * H

    # ---- preamble: hoisted layer-0 input projection over ALL timesteps -------
    # One (B*T, D) x (D, 4H) MXU matmul replaces T tiny dependent ones; the
    # layer-0 bias is folded in here as well (single broadcast).
    xz0 = (jnp.dot(x_ref[...], wih0_ref[...], preferred_element_type=jnp.float32)
           + b0_ref[...])                                            # (B*T, 4H)

    # ---- preamble: fused layer-1 weights / hoisted constants -----------------
    w1 = jnp.concatenate([wih1_ref[...], whh1_ref[...]], axis=0)     # (2H, 4H)
    b1 = jnp.broadcast_to(b1_ref[...], (B, G))                       # hoisted bcast
    whh0 = whh0_ref[...]                                             # (H, 4H)

    def gates(z):
        # One full-width sigmoid pass + one full-width tanh pass (EUP), then
        # slice the i, f, g, o lane chunks (PyTorch gate order).
        s = jax.nn.sigmoid(z)
        th = jnp.tanh(z)
        return s[:, 0:H], s[:, H:2 * H], th[:, 2 * H:3 * H], s[:, 3 * H:4 * H]

    # zero initial states (matches torch.zeros(h0/c0) in forward)
    h0 = jnp.zeros((B, H), jnp.float32)
    c0 = jnp.zeros((B, H), jnp.float32)
    h1 = jnp.zeros((B, H), jnp.float32)
    c1 = jnp.zeros((B, H), jnp.float32)

    # ---- time recurrence: fully unrolled static loop --------------------------
    for t in range(T):
        # Gather the precomputed x-projection rows for step t (rows b*T + t).
        # Independent of the recurrence, so it sits off the serial chain.
        xz_t = jnp.concatenate(
            [xz0[b * T + t:b * T + t + 1, :] for b in range(B)], axis=0)  # (B, 4H)

        # -- layer 0: only the recurrent matmul is left on the serial chain --
        z0 = xz_t + jnp.dot(h0, whh0, preferred_element_type=jnp.float32)
        i0, f0, g0, o0 = gates(z0)
        c0 = f0 * c0 + i0 * g0
        h0 = o0 * jnp.tanh(c0)

        # -- layer 1: one fused matmul per step: [x ; h_prev] @ [W_ih ; W_hh] --
        xh1 = jnp.concatenate([h0, h1], axis=1)                           # (B, 2H)
        z1 = jnp.dot(xh1, w1, preferred_element_type=jnp.float32) + b1
        i1, f1, g1, o1 = gates(z1)
        c1 = f1 * c1 + i1 * g1
        h1 = o1 * jnp.tanh(c1)

    # ---- final Linear on the last top-layer hidden state: fc(out[:, -1, :]) ---
    out_ref[...] = (jnp.dot(h1, wfc_ref[...], preferred_element_type=jnp.float32)
                    + bfc_ref[...])


# -----------------------------------------------------------------------------
# Wrapper
# -----------------------------------------------------------------------------
@jax.jit
def predrnn_forward(x, w_ih0, w_hh0, b0, w_ih1, w_hh1, b1, w_fc, b_fc):
    """x: (B, T, D) batch_first, like the PyTorch module. Returns (B, O)."""
    B, T, D = x.shape
    O = w_fc.shape[1]

    # Contiguous flatten (no transpose, no copy): row index = b*T + t.
    x_flat = x.astype(jnp.float32).reshape(B * T, D)

    vmem = lambda: pl.BlockSpec(memory_space=pltpu.MemorySpace.VMEM)

    return pl.pallas_call(
        predrnn_kernel,
        out_shape=jax.ShapeDtypeStruct((B, O), jnp.float32),
        in_specs=[vmem() for _ in range(9)],
        out_specs=vmem(),
    )(x_flat, w_ih0, w_hh0, b0, w_ih1, w_hh1, b1, w_fc, b_fc)


# -----------------------------------------------------------------------------
# Pure-JAX reference (mirrors nn.LSTM(2 layers, batch_first) + nn.Linear)
# -----------------------------------------------------------------------------
def predrnn_reference(x, w_ih0, w_hh0, b0, w_ih1, w_hh1, b1, w_fc, b_fc):
    B, T, D = x.shape
    H = w_hh0.shape[0]
    h = [jnp.zeros((B, H), jnp.float32) for _ in range(2)]
    c = [jnp.zeros((B, H), jnp.float32) for _ in range(2)]

    def cell(x_in, h_prev, c_prev, wih, whh, b):
        z = x_in @ wih + h_prev @ whh + b
        i = jax.nn.sigmoid(z[:, :H])
        f = jax.nn.sigmoid(z[:, H:2 * H])
        g = jnp.tanh(z[:, 2 * H:3 * H])
        o = jax.nn.sigmoid(z[:, 3 * H:])
        c_new = f * c_prev + i * g
        return o * jnp.tanh(c_new), c_new

    for t in range(T):
        xt = x[:, t, :]
        h[0], c[0] = cell(xt, h[0], c[0], w_ih0, w_hh0, b0)
        h[1], c[1] = cell(h[0], h[1], c[1], w_ih1, w_hh1, b1)
    return h[1] @ w_fc + b_fc


# -----------------------------------------------------------------------------
# Main
# -----------------------------------------------------------------------------
if __name__ == "__main__":
    # Module hyperparameters (num_layers=2 is baked into the kernel, matching
    # the PredRNN instantiation).
    input_dim, hidden_dim, output_dim = 4, 32, 8
    B, T = 2, 8

    key = jax.random.PRNGKey(0)
    keys = jax.random.split(key, 12)
    k = 1.0 / jnp.sqrt(hidden_dim)

    def uni(key, shape):
        return jax.random.uniform(key, shape, jnp.float32, minval=-k, maxval=k)

    # LSTM layer 0 (input_dim -> hidden_dim); weights stored transposed (in, 4H)
    w_ih0 = uni(keys[0], (input_dim, 4 * hidden_dim))
    w_hh0 = uni(keys[1], (hidden_dim, 4 * hidden_dim))
    b0 = uni(keys[2], (1, 4 * hidden_dim)) + uni(keys[3], (1, 4 * hidden_dim))
    # LSTM layer 1 (hidden_dim -> hidden_dim)
    w_ih1 = uni(keys[4], (hidden_dim, 4 * hidden_dim))
    w_hh1 = uni(keys[5], (hidden_dim, 4 * hidden_dim))
    b1 = uni(keys[6], (1, 4 * hidden_dim)) + uni(keys[7], (1, 4 * hidden_dim))
    # Final Linear (hidden_dim -> output_dim), stored transposed (H, O)
    w_fc = uni(keys[8], (hidden_dim, output_dim))
    b_fc = uni(keys[9], (1, output_dim))

    x = jax.random.normal(keys[10], (B, T, input_dim), jnp.float32)

    out = predrnn_forward(x, w_ih0, w_hh0, b0, w_ih1, w_hh1, b1, w_fc, b_fc)
    out = jax.block_until_ready(out)

    ref = predrnn_reference(x, w_ih0, w_hh0, b0, w_ih1, w_hh1, b1, w_fc, b_fc)
    assert out.shape == (B, output_dim)
    assert jnp.allclose(out, ref, atol=1e-4, rtol=1e-4), (out, ref)

    print("KERNEL_OK")
</pallas_src>

<mosaic_0001>
module attributes {stable_mosaic.version = 11 : i64} {
  func.func @predrnn_kernel(%arg0: memref<16x4xf32, #tpu.memory_space<vmem>>, %arg1: memref<4x128xf32, #tpu.memory_space<vmem>>, %arg2: memref<32x128xf32, #tpu.memory_space<vmem>>, %arg3: memref<1x128xf32, #tpu.memory_space<vmem>>, %arg4: memref<32x128xf32, #tpu.memory_space<vmem>>, %arg5: memref<32x128xf32, #tpu.memory_space<vmem>>, %arg6: memref<1x128xf32, #tpu.memory_space<vmem>>, %arg7: memref<32x8xf32, #tpu.memory_space<vmem>>, %arg8: memref<1x8xf32, #tpu.memory_space<vmem>>, %arg9: memref<2x8xf32, #tpu.memory_space<vmem>>) attributes {dimension_semantics = [], scalar_prefetch = 0 : i64, scratch_operands = 0 : i64, tpu.core_type = #tpu.core_type<tc>} {
    %c0 = arith.constant 0 : index
    %c0_0 = arith.constant 0 : index
    %0 = vector.load %arg0[%c0, %c0_0] : memref<16x4xf32, #tpu.memory_space<vmem>>, vector<16x4xf32>
    %c0_1 = arith.constant 0 : index
    %c0_2 = arith.constant 0 : index
    %1 = vector.load %arg1[%c0_1, %c0_2] : memref<4x128xf32, #tpu.memory_space<vmem>>, vector<4x128xf32>
    %cst = arith.constant dense<0.000000e+00> : vector<16x128xf32>
    %2 = tpu.matmul %0, %1, %cst {dimension_numbers = #tpu.dot_dimension_numbers<[1], [0], [0], [1], [0, 0, 1, 1], [], []>} : vector<16x4xf32>, vector<4x128xf32>, vector<16x128xf32> -> vector<16x128xf32>
    %c0_3 = arith.constant 0 : index
    %c0_4 = arith.constant 0 : index
    %3 = vector.load %arg3[%c0_3, %c0_4] : memref<1x128xf32, #tpu.memory_space<vmem>>, vector<1x128xf32>
    %4 = vector.broadcast %3 : vector<1x128xf32> to vector<16x128xf32>
    %5 = arith.addf %2, %4 : vector<16x128xf32>
    %c0_5 = arith.constant 0 : index
    %c0_6 = arith.constant 0 : index
    %6 = vector.load %arg4[%c0_5, %c0_6] : memref<32x128xf32, #tpu.memory_space<vmem>>, vector<32x128xf32>
    %c0_7 = arith.constant 0 : index
    %c0_8 = arith.constant 0 : index
    %7 = vector.load %arg5[%c0_7, %c0_8] : memref<32x128xf32, #tpu.memory_space<vmem>>, vector<32x128xf32>
    %8 = tpu.concatenate %6, %7 in 0 : vector<32x128xf32>, vector<32x128xf32> -> vector<64x128xf32>
    %c0_9 = arith.constant 0 : index
    %c0_10 = arith.constant 0 : index
    %9 = vector.load %arg6[%c0_9, %c0_10] : memref<1x128xf32, #tpu.memory_space<vmem>>, vector<1x128xf32>
    %10 = vector.shape_cast %9 : vector<1x128xf32> to vector<1x128xf32>
    %11 = vector.broadcast %10 : vector<1x128xf32> to vector<2x128xf32>
    %c0_11 = arith.constant 0 : index
    %c0_12 = arith.constant 0 : index
    %12 = vector.load %arg2[%c0_11, %c0_12] : memref<32x128xf32, #tpu.memory_space<vmem>>, vector<32x128xf32>
    %cst_13 = arith.constant 0.000000e+00 : f32
    %13 = vector.broadcast %cst_13 : f32 to vector<2x32xf32>
    %cst_14 = arith.constant 0.000000e+00 : f32
    %14 = vector.broadcast %cst_14 : f32 to vector<2x32xf32>
    %cst_15 = arith.constant 0.000000e+00 : f32
    %15 = vector.broadcast %cst_15 : f32 to vector<2x32xf32>
    %cst_16 = arith.constant 0.000000e+00 : f32
    %16 = vector.broadcast %cst_16 : f32 to vector<2x32xf32>
    %17 = vector.extract_strided_slice %5 {offsets = [0, 0], sizes = [1, 128], strides = [1, 1]} : vector<16x128xf32> to vector<1x128xf32>
    %18 = vector.extract_strided_slice %5 {offsets = [8, 0], sizes = [1, 128], strides = [1, 1]} : vector<16x128xf32> to vector<1x128xf32>
    %19 = tpu.concatenate %17, %18 in 0 : vector<1x128xf32>, vector<1x128xf32> -> vector<2x128xf32>
    %cst_17 = arith.constant dense<0.000000e+00> : vector<2x128xf32>
    %20 = tpu.matmul %13, %12, %cst_17 {dimension_numbers = #tpu.dot_dimension_numbers<[1], [0], [0], [1], [0, 0, 1, 1], [], []>} : vector<2x32xf32>, vector<32x128xf32>, vector<2x128xf32> -> vector<2x128xf32>
    %21 = arith.addf %19, %20 : vector<2x128xf32>
    %22 = arith.negf %21 : vector<2x128xf32>
    %23 = math.exp %22 : vector<2x128xf32>
    %cst_18 = arith.constant 1.000000e+00 : f32
    %24 = vector.broadcast %cst_18 : f32 to vector<2x128xf32>
    %25 = arith.addf %24, %23 : vector<2x128xf32>
    %26 = arith.divf %24, %25 : vector<2x128xf32>
    %27 = math.tanh %21 : vector<2x128xf32>
    %28 = vector.extract_strided_slice %26 {offsets = [0, 0], sizes = [2, 32], strides = [1, 1]} : vector<2x128xf32> to vector<2x32xf32>
    %29 = vector.extract_strided_slice %26 {offsets = [0, 32], sizes = [2, 32], strides = [1, 1]} : vector<2x128xf32> to vector<2x32xf32>
    %30 = vector.extract_strided_slice %27 {offsets = [0, 64], sizes = [2, 32], strides = [1, 1]} : vector<2x128xf32> to vector<2x32xf32>
    %31 = vector.extract_strided_slice %26 {offsets = [0, 96], sizes = [2, 32], strides = [1, 1]} : vector<2x128xf32> to vector<2x32xf32>
    %32 = arith.mulf %29, %14 : vector<2x32xf32>
    %33 = arith.mulf %28, %30 : vector<2x32xf32>
    %34 = arith.addf %32, %33 : vector<2x32xf32>
    %35 = math.tanh %34 : vector<2x32xf32>
    %36 = arith.mulf %31, %35 : vector<2x32xf32>
    %37 = tpu.concatenate %36, %15 in 1 : vector<2x32xf32>, vector<2x32xf32> -> vector<2x64xf32>
    %cst_19 = arith.constant dense<0.000000e+00> : vector<2x128xf32>
    %38 = tpu.matmul %37, %8, %cst_19 {dimension_numbers = #tpu.dot_dimension_numbers<[1], [0], [0], [1], [0, 0, 1, 1], [], []>} : vector<2x64xf32>, vector<64x128xf32>, vector<2x128xf32> -> vector<2x128xf32>
    %39 = arith.addf %38, %11 : vector<2x128xf32>
    %40 = arith.negf %39 : vector<2x128xf32>
    %41 = math.exp %40 : vector<2x128xf32>
    %cst_20 = arith.constant 1.000000e+00 : f32
    %42 = vector.broadcast %cst_20 : f32 to vector<2x128xf32>
    %43 = arith.addf %42, %41 : vector<2x128xf32>
    %44 = arith.divf %42, %43 : vector<2x128xf32>
    %45 = math.tanh %39 : vector<2x128xf32>
    %46 = vector.extract_strided_slice %44 {offsets = [0, 0], sizes = [2, 32], strides = [1, 1]} : vector<2x128xf32> to vector<2x32xf32>
    %47 = vector.extract_strided_slice %44 {offsets = [0, 32], sizes = [2, 32], strides = [1, 1]} : vector<2x128xf32> to vector<2x32xf32>
    %48 = vector.extract_strided_slice %45 {offsets = [0, 64], sizes = [2, 32], strides = [1, 1]} : vector<2x128xf32> to vector<2x32xf32>
    %49 = vector.extract_strided_slice %44 {offsets = [0, 96], sizes = [2, 32], strides = [1, 1]} : vector<2x128xf32> to vector<2x32xf32>
    %50 = arith.mulf %47, %16 : vector<2x32xf32>
    %51 = arith.mulf %46, %48 : vector<2x32xf32>
    %52 = arith.addf %50, %51 : vector<2x32xf32>
    %53 = math.tanh %52 : vector<2x32xf32>
    %54 = arith.mulf %49, %53 : vector<2x32xf32>
    %55 = vector.extract_strided_slice %5 {offsets = [1, 0], sizes = [1, 128], strides = [1, 1]} : vector<16x128xf32> to vector<1x128xf32>
    %56 = vector.extract_strided_slice %5 {offsets = [9, 0], sizes = [1, 128], strides = [1, 1]} : vector<16x128xf32> to vector<1x128xf32>
    %57 = tpu.concatenate %55, %56 in 0 : vector<1x128xf32>, vector<1x128xf32> -> vector<2x128xf32>
    %cst_21 = arith.constant dense<0.000000e+00> : vector<2x128xf32>
    %58 = tpu.matmul %36, %12, %cst_21 {dimension_numbers = #tpu.dot_dimension_numbers<[1], [0], [0], [1], [0, 0, 1, 1], [], []>} : vector<2x32xf32>, vector<32x128xf32>, vector<2x128xf32> -> vector<2x128xf32>
    %59 = arith.addf %57, %58 : vector<2x128xf32>
    %60 = arith.negf %59 : vector<2x128xf32>
    %61 = math.exp %60 : vector<2x128xf32>
    %cst_22 = arith.constant 1.000000e+00 : f32
    %62 = vector.broadcast %cst_22 : f32 to vector<2x128xf32>
    %63 = arith.addf %62, %61 : vector<2x128xf32>
    %64 = arith.divf %62, %63 : vector<2x128xf32>
    %65 = math.tanh %59 : vector<2x128xf32>
    %66 = vector.extract_strided_slice %64 {offsets = [0, 0], sizes = [2, 32], strides = [1, 1]} : vector<2x128xf32> to vector<2x32xf32>
    %67 = vector.extract_strided_slice %64 {offsets = [0, 32], sizes = [2, 32], strides = [1, 1]} : vector<2x128xf32> to vector<2x32xf32>
    %68 = vector.extract_strided_slice %65 {offsets = [0, 64], sizes = [2, 32], strides = [1, 1]} : vector<2x128xf32> to vector<2x32xf32>
    %69 = vector.extract_strided_slice %64 {offsets = [0, 96], sizes = [2, 32], strides = [1, 1]} : vector<2x128xf32> to vector<2x32xf32>
    %70 = arith.mulf %67, %34 : vector<2x32xf32>
    %71 = arith.mulf %66, %68 : vector<2x32xf32>
    %72 = arith.addf %70, %71 : vector<2x32xf32>
    %73 = math.tanh %72 : vector<2x32xf32>
    %74 = arith.mulf %69, %73 : vector<2x32xf32>
    %75 = tpu.concatenate %74, %54 in 1 : vector<2x32xf32>, vector<2x32xf32> -> vector<2x64xf32>
    %cst_23 = arith.constant dense<0.000000e+00> : vector<2x128xf32>
    %76 = tpu.matmul %75, %8, %cst_23 {dimension_numbers = #tpu.dot_dimension_numbers<[1], [0], [0], [1], [0, 0, 1, 1], [], []>} : vector<2x64xf32>, vector<64x128xf32>, vector<2x128xf32> -> vector<2x128xf32>
    %77 = arith.addf %76, %11 : vector<2x128xf32>
    %78 = arith.negf %77 : vector<2x128xf32>
    %79 = math.exp %78 : vector<2x128xf32>
    %cst_24 = arith.constant 1.000000e+00 : f32
    %80 = vector.broadcast %cst_24 : f32 to vector<2x128xf32>
    %81 = arith.addf %80, %79 : vector<2x128xf32>
    %82 = arith.divf %80, %81 : vector<2x128xf32>
    %83 = math.tanh %77 : vector<2x128xf32>
    %84 = vector.extract_strided_slice %82 {offsets = [0, 0], sizes = [2, 32], strides = [1, 1]} : vector<2x128xf32> to vector<2x32xf32>
    %85 = vector.extract_strided_slice %82 {offsets = [0, 32], sizes = [2, 32], strides = [1, 1]} : vector<2x128xf32> to vector<2x32xf32>
    %86 = vector.extract_strided_slice %83 {offsets = [0, 64], sizes = [2, 32], strides = [1, 1]} : vector<2x128xf32> to vector<2x32xf32>
    %87 = vector.extract_strided_slice %82 {offsets = [0, 96], sizes = [2, 32], strides = [1, 1]} : vector<2x128xf32> to vector<2x32xf32>
    %88 = arith.mulf %85, %52 : vector<2x32xf32>
    %89 = arith.mulf %84, %86 : vector<2x32xf32>
    %90 = arith.addf %88, %89 : vector<2x32xf32>
    %91 = math.tanh %90 : vector<2x32xf32>
    %92 = arith.mulf %87, %91 : vector<2x32xf32>
    %93 = vector.extract_strided_slice %5 {offsets = [2, 0], sizes = [1, 128], strides = [1, 1]} : vector<16x128xf32> to vector<1x128xf32>
    %94 = vector.extract_strided_slice %5 {offsets = [10, 0], sizes = [1, 128], strides = [1, 1]} : vector<16x128xf32> to vector<1x128xf32>
    %95 = tpu.concatenate %93, %94 in 0 : vector<1x128xf32>, vector<1x128xf32> -> vector<2x128xf32>
    %cst_25 = arith.constant dense<0.000000e+00> : vector<2x128xf32>
    %96 = tpu.matmul %74, %12, %cst_25 {dimension_numbers = #tpu.dot_dimension_numbers<[1], [0], [0], [1], [0, 0, 1, 1], [], []>} : vector<2x32xf32>, vector<32x128xf32>, vector<2x128xf32> -> vector<2x128xf32>
    %97 = arith.addf %95, %96 : vector<2x128xf32>
    %98 = arith.negf %97 : vector<2x128xf32>
    %99 = math.exp %98 : vector<2x128xf32>
    %cst_26 = arith.constant 1.000000e+00 : f32
    %100 = vector.broadcast %cst_26 : f32 to vector<2x128xf32>
    %101 = arith.addf %100, %99 : vector<2x128xf32>
    %102 = arith.divf %100, %101 : vector<2x128xf32>
    %103 = math.tanh %97 : vector<2x128xf32>
    %104 = vector.extract_strided_slice %102 {offsets = [0, 0], sizes = [2, 32], strides = [1, 1]} : vector<2x128xf32> to vector<2x32xf32>
    %105 = vector.extract_strided_slice %102 {offsets = [0, 32], sizes = [2, 32], strides = [1, 1]} : vector<2x128xf32> to vector<2x32xf32>
    %106 = vector.extract_strided_slice %103 {offsets = [0, 64], sizes = [2, 32], strides = [1, 1]} : vector<2x128xf32> to vector<2x32xf32>
    %107 = vector.extract_strided_slice %102 {offsets = [0, 96], sizes = [2, 32], strides = [1, 1]} : vector<2x128xf32> to vector<2x32xf32>
    %108 = arith.mulf %105, %72 : vector<2x32xf32>
    %109 = arith.mulf %104, %106 : vector<2x32xf32>
    %110 = arith.addf %108, %109 : vector<2x32xf32>
    %111 = math.tanh %110 : vector<2x32xf32>
    %112 = arith.mulf %107, %111 : vector<2x32xf32>
    %113 = tpu.concatenate %112, %92 in 1 : vector<2x32xf32>, vector<2x32xf32> -> vector<2x64xf32>
    %cst_27 = arith.constant dense<0.000000e+00> : vector<2x128xf32>
    %114 = tpu.matmul %113, %8, %cst_27 {dimension_numbers = #tpu.dot_dimension_numbers<[1], [0], [0], [1], [0, 0, 1, 1], [], []>} : vector<2x64xf32>, vector<64x128xf32>, vector<2x128xf32> -> vector<2x128xf32>
    %115 = arith.addf %114, %11 : vector<2x128xf32>
    %116 = arith.negf %115 : vector<2x128xf32>
    %117 = math.exp %116 : vector<2x128xf32>
    %cst_28 = arith.constant 1.000000e+00 : f32
    %118 = vector.broadcast %cst_28 : f32 to vector<2x128xf32>
    %119 = arith.addf %118, %117 : vector<2x128xf32>
    %120 = arith.divf %118, %119 : vector<2x128xf32>
    %121 = math.tanh %115 : vector<2x128xf32>
    %122 = vector.extract_strided_slice %120 {offsets = [0, 0], sizes = [2, 32], strides = [1, 1]} : vector<2x128xf32> to vector<2x32xf32>
    %123 = vector.extract_strided_slice %120 {offsets = [0, 32], sizes = [2, 32], strides = [1, 1]} : vector<2x128xf32> to vector<2x32xf32>
    %124 = vector.extract_strided_slice %121 {offsets = [0, 64], sizes = [2, 32], strides = [1, 1]} : vector<2x128xf32> to vector<2x32xf32>
    %125 = vector.extract_strided_slice %120 {offsets = [0, 96], sizes = [2, 32], strides = [1, 1]} : vector<2x128xf32> to vector<2x32xf32>
    %126 = arith.mulf %123, %90 : vector<2x32xf32>
    %127 = arith.mulf %122, %124 : vector<2x32xf32>
    %128 = arith.addf %126, %127 : vector<2x32xf32>
    %129 = math.tanh %128 : vector<2x32xf32>
    %130 = arith.mulf %125, %129 : vector<2x32xf32>
    %131 = vector.extract_strided_slice %5 {offsets = [3, 0], sizes = [1, 128], strides = [1, 1]} : vector<16x128xf32> to vector<1x128xf32>
    %132 = vector.extract_strided_slice %5 {offsets = [11, 0], sizes = [1, 128], strides = [1, 1]} : vector<16x128xf32> to vector<1x128xf32>
    %133 = tpu.concatenate %131, %132 in 0 : vector<1x128xf32>, vector<1x128xf32> -> vector<2x128xf32>
    %cst_29 = arith.constant dense<0.000000e+00> : vector<2x128xf32>
    %134 = tpu.matmul %112, %12, %cst_29 {dimension_numbers = #tpu.dot_dimension_numbers<[1], [0], [0], [1], [0, 0, 1, 1], [], []>} : vector<2x32xf32>, vector<32x128xf32>, vector<2x128xf32> -> vector<2x128xf32>
    %135 = arith.addf %133, %134 : vector<2x128xf32>
    %136 = arith.negf %135 : vector<2x128xf32>
    %137 = math.exp %136 : vector<2x128xf32>
    %cst_30 = arith.constant 1.000000e+00 : f32
    %138 = vector.broadcast %cst_30 : f32 to vector<2x128xf32>
    %139 = arith.addf %138, %137 : vector<2x128xf32>
    %140 = arith.divf %138, %139 : vector<2x128xf32>
    %141 = math.tanh %135 : vector<2x128xf32>
    %142 = vector.extract_strided_slice %140 {offsets = [0, 0], sizes = [2, 32], strides = [1, 1]} : vector<2x128xf32> to vector<2x32xf32>
    %143 = vector.extract_strided_slice %140 {offsets = [0, 32], sizes = [2, 32], strides = [1, 1]} : vector<2x128xf32> to vector<2x32xf32>
    %144 = vector.extract_strided_slice %141 {offsets = [0, 64], sizes = [2, 32], strides = [1, 1]} : vector<2x128xf32> to vector<2x32xf32>
    %145 = vector.extract_strided_slice %140 {offsets = [0, 96], sizes = [2, 32], strides = [1, 1]} : vector<2x128xf32> to vector<2x32xf32>
    %146 = arith.mulf %143, %110 : vector<2x32xf32>
    %147 = arith.mulf %142, %144 : vector<2x32xf32>
    %148 = arith.addf %146, %147 : vector<2x32xf32>
    %149 = math.tanh %148 : vector<2x32xf32>
    %150 = arith.mulf %145, %149 : vector<2x32xf32>
    %151 = tpu.concatenate %150, %130 in 1 : vector<2x32xf32>, vector<2x32xf32> -> vector<2x64xf32>
    %cst_31 = arith.constant dense<0.000000e+00> : vector<2x128xf32>
    %152 = tpu.matmul %151, %8, %cst_31 {dimension_numbers = #tpu.dot_dimension_numbers<[1], [0], [0], [1], [0, 0, 1, 1], [], []>} : vector<2x64xf32>, vector<64x128xf32>, vector<2x128xf32> -> vector<2x128xf32>
    %153 = arith.addf %152, %11 : vector<2x128xf32>
    %154 = arith.negf %153 : vector<2x128xf32>
    %155 = math.exp %154 : vector<2x128xf32>
    %cst_32 = arith.constant 1.000000e+00 : f32
    %156 = vector.broadcast %cst_32 : f32 to vector<2x128xf32>
    %157 = arith.addf %156, %155 : vector<2x128xf32>
    %158 = arith.divf %156, %157 : vector<2x128xf32>
    %159 = math.tanh %153 : vector<2x128xf32>
    %160 = vector.extract_strided_slice %158 {offsets = [0, 0], sizes = [2, 32], strides = [1, 1]} : vector<2x128xf32> to vector<2x32xf32>
    %161 = vector.extract_strided_slice %158 {offsets = [0, 32], sizes = [2, 32], strides = [1, 1]} : vector<2x128xf32> to vector<2x32xf32>
    %162 = vector.extract_strided_slice %159 {offsets = [0, 64], sizes = [2, 32], strides = [1, 1]} : vector<2x128xf32> to vector<2x32xf32>
    %163 = vector.extract_strided_slice %158 {offsets = [0, 96], sizes = [2, 32], strides = [1, 1]} : vector<2x128xf32> to vector<2x32xf32>
    %164 = arith.mulf %161, %128 : vector<2x32xf32>
    %165 = arith.mulf %160, %162 : vector<2x32xf32>
    %166 = arith.addf %164, %165 : vector<2x32xf32>
    %167 = math.tanh %166 : vector<2x32xf32>
    %168 = arith.mulf %163, %167 : vector<2x32xf32>
    %169 = vector.extract_strided_slice %5 {offsets = [4, 0], sizes = [1, 128], strides = [1, 1]} : vector<16x128xf32> to vector<1x128xf32>
    %170 = vector.extract_strided_slice %5 {offsets = [12, 0], sizes = [1, 128], strides = [1, 1]} : vector<16x128xf32> to vector<1x128xf32>
    %171 = tpu.concatenate %169, %170 in 0 : vector<1x128xf32>, vector<1x128xf32> -> vector<2x128xf32>
    %cst_33 = arith.constant dense<0.000000e+00> : vector<2x128xf32>
    %172 = tpu.matmul %150, %12, %cst_33 {dimension_numbers = #tpu.dot_dimension_numbers<[1], [0], [0], [1], [0, 0, 1, 1], [], []>} : vector<2x32xf32>, vector<32x128xf32>, vector<2x128xf32> -> vector<2x128xf32>
    %173 = arith.addf %171, %172 : vector<2x128xf32>
    %174 = arith.negf %173 : vector<2x128xf32>
    %175 = math.exp %174 : vector<2x128xf32>
    %cst_34 = arith.constant 1.000000e+00 : f32
    %176 = vector.broadcast %cst_34 : f32 to vector<2x128xf32>
    %177 = arith.addf %176, %175 : vector<2x128xf32>
    %178 = arith.divf %176, %177 : vector<2x128xf32>
    %179 = math.tanh %173 : vector<2x128xf32>
    %180 = vector.extract_strided_slice %178 {offsets = [0, 0], sizes = [2, 32], strides = [1, 1]} : vector<2x128xf32> to vector<2x32xf32>
    %181 = vector.extract_strided_slice %178 {offsets = [0, 32], sizes = [2, 32], strides = [1, 1]} : vector<2x128xf32> to vector<2x32xf32>
    %182 = vector.extract_strided_slice %179 {offsets = [0, 64], sizes = [2, 32], strides = [1, 1]} : vector<2x128xf32> to vector<2x32xf32>
    %183 = vector.extract_strided_slice %178 {offsets = [0, 96], sizes = [2, 32], strides = [1, 1]} : vector<2x128xf32> to vector<2x32xf32>
    %184 = arith.mulf %181, %148 : vector<2x32xf32>
    %185 = arith.mulf %180, %182 : vector<2x32xf32>
    %186 = arith.addf %184, %185 : vector<2x32xf32>
    %187 = math.tanh %186 : vector<2x32xf32>
    %188 = arith.mulf %183, %187 : vector<2x32xf32>
    %189 = tpu.concatenate %188, %168 in 1 : vector<2x32xf32>, vector<2x32xf32> -> vector<2x64xf32>
    %cst_35 = arith.constant dense<0.000000e+00> : vector<2x128xf32>
    %190 = tpu.matmul %189, %8, %cst_35 {dimension_numbers = #tpu.dot_dimension_numbers<[1], [0], [0], [1], [0, 0, 1, 1], [], []>} : vector<2x64xf32>, vector<64x128xf32>, vector<2x128xf32> -> vector<2x128xf32>
    %191 = arith.addf %190, %11 : vector<2x128xf32>
    %192 = arith.negf %191 : vector<2x128xf32>
    %193 = math.exp %192 : vector<2x128xf32>
    %cst_36 = arith.constant 1.000000e+00 : f32
    %194 = vector.broadcast %cst_36 : f32 to vector<2x128xf32>
    %195 = arith.addf %194, %193 : vector<2x128xf32>
    %196 = arith.divf %194, %195 : vector<2x128xf32>
    %197 = math.tanh %191 : vector<2x128xf32>
    %198 = vector.extract_strided_slice %196 {offsets = [0, 0], sizes = [2, 32], strides = [1, 1]} : vector<2x128xf32> to vector<2x32xf32>
    %199 = vector.extract_strided_slice %196 {offsets = [0, 32], sizes = [2, 32], strides = [1, 1]} : vector<2x128xf32> to vector<2x32xf32>
    %200 = vector.extract_strided_slice %197 {offsets = [0, 64], sizes = [2, 32], strides = [1, 1]} : vector<2x128xf32> to vector<2x32xf32>
    %201 = vector.extract_strided_slice %196 {offsets = [0, 96], sizes = [2, 32], strides = [1, 1]} : vector<2x128xf32> to vector<2x32xf32>
    %202 = arith.mulf %199, %166 : vector<2x32xf32>
    %203 = arith.mulf %198, %200 : vector<2x32xf32>
    %204 = arith.addf %202, %203 : vector<2x32xf32>
    %205 = math.tanh %204 : vector<2x32xf32>
    %206 = arith.mulf %201, %205 : vector<2x32xf32>
    %207 = vector.extract_strided_slice %5 {offsets = [5, 0], sizes = [1, 128], strides = [1, 1]} : vector<16x128xf32> to vector<1x128xf32>
    %208 = vector.extract_strided_slice %5 {offsets = [13, 0], sizes = [1, 128], strides = [1, 1]} : vector<16x128xf32> to vector<1x128xf32>
    %209 = tpu.concatenate %207, %208 in 0 : vector<1x128xf32>, vector<1x128xf32> -> vector<2x128xf32>
    %cst_37 = arith.constant dense<0.000000e+00> : vector<2x128xf32>
    %210 = tpu.matmul %188, %12, %cst_37 {dimension_numbers = #tpu.dot_dimension_numbers<[1], [0], [0], [1], [0, 0, 1, 1], [], []>} : vector<2x32xf32>, vector<32x128xf32>, vector<2x128xf32> -> vector<2x128xf32>
    %211 = arith.addf %209, %210 : vector<2x128xf32>
    %212 = arith.negf %211 : vector<2x128xf32>
    %213 = math.exp %212 : vector<2x128xf32>
    %cst_38 = arith.constant 1.000000e+00 : f32
    %214 = vector.broadcast %cst_38 : f32 to vector<2x128xf32>
    %215 = arith.addf %214, %213 : vector<2x128xf32>
    %216 = arith.divf %214, %215 : vector<2x128xf32>
    %217 = math.tanh %211 : vector<2x128xf32>
    %218 = vector.extract_strided_slice %216 {offsets = [0, 0], sizes = [2, 32], strides = [1, 1]} : vector<2x128xf32> to vector<2x32xf32>
    %219 = vector.extract_strided_slice %216 {offsets = [0, 32], sizes = [2, 32], strides = [1, 1]} : vector<2x128xf32> to vector<2x32xf32>
    %220 = vector.extract_strided_slice %217 {offsets = [0, 64], sizes = [2, 32], strides = [1, 1]} : vector<2x128xf32> to vector<2x32xf32>
    %221 = vector.extract_strided_slice %216 {offsets = [0, 96], sizes = [2, 32], strides = [1, 1]} : vector<2x128xf32> to vector<2x32xf32>
    %222 = arith.mulf %219, %186 : vector<2x32xf32>
    %223 = arith.mulf %218, %220 : vector<2x32xf32>
    %224 = arith.addf %222, %223 : vector<2x32xf32>
    %225 = math.tanh %224 : vector<2x32xf32>
    %226 = arith.mulf %221, %225 : vector<2x32xf32>
    %227 = tpu.concatenate %226, %206 in 1 : vector<2x32xf32>, vector<2x32xf32> -> vector<2x64xf32>
    %cst_39 = arith.constant dense<0.000000e+00> : vector<2x128xf32>
    %228 = tpu.matmul %227, %8, %cst_39 {dimension_numbers = #tpu.dot_dimension_numbers<[1], [0], [0], [1], [0, 0, 1, 1], [], []>} : vector<2x64xf32>, vector<64x128xf32>, vector<2x128xf32> -> vector<2x128xf32>
    %229 = arith.addf %228, %11 : vector<2x128xf32>
    %230 = arith.negf %229 : vector<2x128xf32>
    %231 = math.exp %230 : vector<2x128xf32>
    %cst_40 = arith.constant 1.000000e+00 : f32
    %232 = vector.broadcast %cst_40 : f32 to vector<2x128xf32>
    %233 = arith.addf %232, %231 : vector<2x128xf32>
    %234 = arith.divf %232, %233 : vector<2x128xf32>
    %235 = math.tanh %229 : vector<2x128xf32>
    %236 = vector.extract_strided_slice %234 {offsets = [0, 0], sizes = [2, 32], strides = [1, 1]} : vector<2x128xf32> to vector<2x32xf32>
    %237 = vector.extract_strided_slice %234 {offsets = [0, 32], sizes = [2, 32], strides = [1, 1]} : vector<2x128xf32> to vector<2x32xf32>
    %238 = vector.extract_strided_slice %235 {offsets = [0, 64], sizes = [2, 32], strides = [1, 1]} : vector<2x128xf32> to vector<2x32xf32>
    %239 = vector.extract_strided_slice %234 {offsets = [0, 96], sizes = [2, 32], strides = [1, 1]} : vector<2x128xf32> to vector<2x32xf32>
    %240 = arith.mulf %237, %204 : vector<2x32xf32>
    %241 = arith.mulf %236, %238 : vector<2x32xf32>
    %242 = arith.addf %240, %241 : vector<2x32xf32>
    %243 = math.tanh %242 : vector<2x32xf32>
    %244 = arith.mulf %239, %243 : vector<2x32xf32>
    %245 = vector.extract_strided_slice %5 {offsets = [6, 0], sizes = [1, 128], strides = [1, 1]} : vector<16x128xf32> to vector<1x128xf32>
    %246 = vector.extract_strided_slice %5 {offsets = [14, 0], sizes = [1, 128], strides = [1, 1]} : vector<16x128xf32> to vector<1x128xf32>
    %247 = tpu.concatenate %245, %246 in 0 : vector<1x128xf32>, vector<1x128xf32> -> vector<2x128xf32>
    %cst_41 = arith.constant dense<0.000000e+00> : vector<2x128xf32>
    %248 = tpu.matmul %226, %12, %cst_41 {dimension_numbers = #tpu.dot_dimension_numbers<[1], [0], [0], [1], [0, 0, 1, 1], [], []>} : vector<2x32xf32>, vector<32x128xf32>, vector<2x128xf32> -> vector<2x128xf32>
    %249 = arith.addf %247, %248 : vector<2x128xf32>
    %250 = arith.negf %249 : vector<2x128xf32>
    %251 = math.exp %250 : vector<2x128xf32>
    %cst_42 = arith.constant 1.000000e+00 : f32
    %252 = vector.broadcast %cst_42 : f32 to vector<2x128xf32>
    %253 = arith.addf %252, %251 : vector<2x128xf32>
    %254 = arith.divf %252, %253 : vector<2x128xf32>
    %255 = math.tanh %249 : vector<2x128xf32>
    %256 = vector.extract_strided_slice %254 {offsets = [0, 0], sizes = [2, 32], strides = [1, 1]} : vector<2x128xf32> to vector<2x32xf32>
    %257 = vector.extract_strided_slice %254 {offsets = [0, 32], sizes = [2, 32], strides = [1, 1]} : vector<2x128xf32> to vector<2x32xf32>
    %258 = vector.extract_strided_slice %255 {offsets = [0, 64], sizes = [2, 32], strides = [1, 1]} : vector<2x128xf32> to vector<2x32xf32>
    %259 = vector.extract_strided_slice %254 {offsets = [0, 96], sizes = [2, 32], strides = [1, 1]} : vector<2x128xf32> to vector<2x32xf32>
    %260 = arith.mulf %257, %224 : vector<2x32xf32>
    %261 = arith.mulf %256, %258 : vector<2x32xf32>
    %262 = arith.addf %260, %261 : vector<2x32xf32>
    %263 = math.tanh %262 : vector<2x32xf32>
    %264 = arith.mulf %259, %263 : vector<2x32xf32>
    %265 = tpu.concatenate %264, %244 in 1 : vector<2x32xf32>, vector<2x32xf32> -> vector<2x64xf32>
    %cst_43 = arith.constant dense<0.000000e+00> : vector<2x128xf32>
    %266 = tpu.matmul %265, %8, %cst_43 {dimension_numbers = #tpu.dot_dimension_numbers<[1], [0], [0], [1], [0, 0, 1, 1], [], []>} : vector<2x64xf32>, vector<64x128xf32>, vector<2x128xf32> -> vector<2x128xf32>
    %267 = arith.addf %266, %11 : vector<2x128xf32>
    %268 = arith.negf %267 : vector<2x128xf32>
    %269 = math.exp %268 : vector<2x128xf32>
    %cst_44 = arith.constant 1.000000e+00 : f32
    %270 = vector.broadcast %cst_44 : f32 to vector<2x128xf32>
    %271 = arith.addf %270, %269 : vector<2x128xf32>
    %272 = arith.divf %270, %271 : vector<2x128xf32>
    %273 = math.tanh %267 : vector<2x128xf32>
    %274 = vector.extract_strided_slice %272 {offsets = [0, 0], sizes = [2, 32], strides = [1, 1]} : vector<2x128xf32> to vector<2x32xf32>
    %275 = vector.extract_strided_slice %272 {offsets = [0, 32], sizes = [2, 32], strides = [1, 1]} : vector<2x128xf32> to vector<2x32xf32>
    %276 = vector.extract_strided_slice %273 {offsets = [0, 64], sizes = [2, 32], strides = [1, 1]} : vector<2x128xf32> to vector<2x32xf32>
    %277 = vector.extract_strided_slice %272 {offsets = [0, 96], sizes = [2, 32], strides = [1, 1]} : vector<2x128xf32> to vector<2x32xf32>
    %278 = arith.mulf %275, %242 : vector<2x32xf32>
    %279 = arith.mulf %274, %276 : vector<2x32xf32>
    %280 = arith.addf %278, %279 : vector<2x32xf32>
    %281 = math.tanh %280 : vector<2x32xf32>
    %282 = arith.mulf %277, %281 : vector<2x32xf32>
    %283 = vector.extract_strided_slice %5 {offsets = [7, 0], sizes = [1, 128], strides = [1, 1]} : vector<16x128xf32> to vector<1x128xf32>
    %284 = vector.extract_strided_slice %5 {offsets = [15, 0], sizes = [1, 128], strides = [1, 1]} : vector<16x128xf32> to vector<1x128xf32>
    %285 = tpu.concatenate %283, %284 in 0 : vector<1x128xf32>, vector<1x128xf32> -> vector<2x128xf32>
    %cst_45 = arith.constant dense<0.000000e+00> : vector<2x128xf32>
    %286 = tpu.matmul %264, %12, %cst_45 {dimension_numbers = #tpu.dot_dimension_numbers<[1], [0], [0], [1], [0, 0, 1, 1], [], []>} : vector<2x32xf32>, vector<32x128xf32>, vector<2x128xf32> -> vector<2x128xf32>
    %287 = arith.addf %285, %286 : vector<2x128xf32>
    %288 = arith.negf %287 : vector<2x128xf32>
    %289 = math.exp %288 : vector<2x128xf32>
    %cst_46 = arith.constant 1.000000e+00 : f32
    %290 = vector.broadcast %cst_46 : f32 to vector<2x128xf32>
    %291 = arith.addf %290, %289 : vector<2x128xf32>
    %292 = arith.divf %290, %291 : vector<2x128xf32>
    %293 = math.tanh %287 : vector<2x128xf32>
    %294 = vector.extract_strided_slice %292 {offsets = [0, 0], sizes = [2, 32], strides = [1, 1]} : vector<2x128xf32> to vector<2x32xf32>
    %295 = vector.extract_strided_slice %292 {offsets = [0, 32], sizes = [2, 32], strides = [1, 1]} : vector<2x128xf32> to vector<2x32xf32>
    %296 = vector.extract_strided_slice %293 {offsets = [0, 64], sizes = [2, 32], strides = [1, 1]} : vector<2x128xf32> to vector<2x32xf32>
    %297 = vector.extract_strided_slice %292 {offsets = [0, 96], sizes = [2, 32], strides = [1, 1]} : vector<2x128xf32> to vector<2x32xf32>
    %298 = arith.mulf %295, %262 : vector<2x32xf32>
    %299 = arith.mulf %294, %296 : vector<2x32xf32>
    %300 = arith.addf %298, %299 : vector<2x32xf32>
    %301 = math.tanh %300 : vector<2x32xf32>
    %302 = arith.mulf %297, %301 : vector<2x32xf32>
    %303 = tpu.concatenate %302, %282 in 1 : vector<2x32xf32>, vector<2x32xf32> -> vector<2x64xf32>
    %cst_47 = arith.constant dense<0.000000e+00> : vector<2x128xf32>
    %304 = tpu.matmul %303, %8, %cst_47 {dimension_numbers = #tpu.dot_dimension_numbers<[1], [0], [0], [1], [0, 0, 1, 1], [], []>} : vector<2x64xf32>, vector<64x128xf32>, vector<2x128xf32> -> vector<2x128xf32>
    %305 = arith.addf %304, %11 : vector<2x128xf32>
    %306 = arith.negf %305 : vector<2x128xf32>
    %307 = math.exp %306 : vector<2x128xf32>
    %cst_48 = arith.constant 1.000000e+00 : f32
    %308 = vector.broadcast %cst_48 : f32 to vector<2x128xf32>
    %309 = arith.addf %308, %307 : vector<2x128xf32>
    %310 = arith.divf %308, %309 : vector<2x128xf32>
    %311 = math.tanh %305 : vector<2x128xf32>
    %312 = vector.extract_strided_slice %310 {offsets = [0, 0], sizes = [2, 32], strides = [1, 1]} : vector<2x128xf32> to vector<2x32xf32>
    %313 = vector.extract_strided_slice %310 {offsets = [0, 32], sizes = [2, 32], strides = [1, 1]} : vector<2x128xf32> to vector<2x32xf32>
    %314 = vector.extract_strided_slice %311 {offsets = [0, 64], sizes = [2, 32], strides = [1, 1]} : vector<2x128xf32> to vector<2x32xf32>
    %315 = vector.extract_strided_slice %310 {offsets = [0, 96], sizes = [2, 32], strides = [1, 1]} : vector<2x128xf32> to vector<2x32xf32>
    %316 = arith.mulf %313, %280 : vector<2x32xf32>
    %317 = arith.mulf %312, %314 : vector<2x32xf32>
    %318 = arith.addf %316, %317 : vector<2x32xf32>
    %319 = math.tanh %318 : vector<2x32xf32>
    %320 = arith.mulf %315, %319 : vector<2x32xf32>
    %c0_49 = arith.constant 0 : index
    %c0_50 = arith.constant 0 : index
    %321 = vector.load %arg7[%c0_49, %c0_50] : memref<32x8xf32, #tpu.memory_space<vmem>>, vector<32x8xf32>
    %cst_51 = arith.constant dense<0.000000e+00> : vector<2x8xf32>
    %322 = tpu.matmul %320, %321, %cst_51 {dimension_numbers = #tpu.dot_dimension_numbers<[1], [0], [0], [1], [0, 0, 1, 1], [], []>} : vector<2x32xf32>, vector<32x8xf32>, vector<2x8xf32> -> vector<2x8xf32>
    %c0_52 = arith.constant 0 : index
    %c0_53 = arith.constant 0 : index
    %323 = vector.load %arg8[%c0_52, %c0_53] : memref<1x8xf32, #tpu.memory_space<vmem>>, vector<1x8xf32>
    %324 = vector.broadcast %323 : vector<1x8xf32> to vector<2x8xf32>
    %325 = arith.addf %322, %324 : vector<2x8xf32>
    %c0_54 = arith.constant 0 : index
    %c0_55 = arith.constant 0 : index
    %326 = vector.load %arg9[%c0_54, %c0_55] : memref<2x8xf32, #tpu.memory_space<vmem>>, vector<2x8xf32>
    tpu.vector_store %arg9[%c0_54, %c0_55], %325 {strides = array<i32>} : memref<2x8xf32, #tpu.memory_space<vmem>>, vector<2x8xf32>,
    return
  }
}

</mosaic_0001>

<bundles_post_ra>
// kernel: predrnn_forward.1
= control target key start
LH: loop header
LB: loop body
LE: loop exit
PB: predicated region body
PF: predicated region fallthrough
CT: control target
= control target key end

     0   :  { %14 = vsyncpa [#allocation3], 0  ;;  %s3184_s0 = inlined_call_operand.vmem [shape: f32[16,4], index: 0, kind: input, shape index: {}]   ;;  %s3185_s1 = inlined_call_operand.hbm [shape: f32[4,128], index: 1, kind: input, shape index: {}]   ;;  %s3186_s2 = inlined_call_operand.vmem [shape: f32[32,128], index: 2, kind: input, shape index: {}]   ;;  %s3187_s3 = inlined_call_operand.vmem [shape: f32[1,128], index: 3, kind: input, shape index: {}]   ;;  %s3188_s4 = inlined_call_operand.vmem [shape: f32[32,128], index: 4, kind: input, shape index: {}]   ;;  %s3189_s5 = inlined_call_operand.hbm [shape: f32[32,128], index: 5, kind: input, shape index: {}]   ;;  %s3190_s6 = inlined_call_operand.vmem [shape: f32[1,128], index: 6, kind: input, shape index: {}]   ;;  %s3191_s7 = inlined_call_operand.vmem [shape: f32[32,8], index: 7, kind: input, shape index: {}]   ;;  %s3192_s8 = inlined_call_operand.vmem [shape: f32[1,8], index: 8, kind: input, shape index: {}]   ;;  %s3193_s9 = inlined_call_operand.hbm [shape: f32[2,8], index: 9, kind: output, shape index: {}]  }
   0x1   :  { %15 = vsyncpa [#allocation6], 0 }
   0x2   :  { %16 = vsyncpa [#allocation4], 0  ;;  %s2714_s30 = smov [#allocation2]   ;;  %s2715_s11 = smov [#allocation5]  }
   0x3   :  { %s25_s10 = sshll.u32 %s2714_s30, 4  ;;  %s40_s12 = sshll.u32 %s2715_s11, 4  ;;  %s26_s10 = int_to_ptr.vmem [resolvable:$true] %s25_s10  ;;  %s2774_s12 = int_to_ptr.vmem [resolvable:$true] %s40_s12 }
   0x4   :  { %s2642_s15 = scalar_lea.hbm %s3185_s1, 64 }
   0x5   :  { %p2643_p0 = scmp.ne.s32.totalorder %s3185_s1, %s2642_s15  ;;  %p2646_p1 = scmp.lt.u32.totalorder %s2642_s15, %s3185_s1 }
   0x7   :  { %p2648_p2 = pnand %p2646_p1, %p2643_p0 }
   0x9   :  { %2651 = shalt.err (!%p2648_p2)
}
   0xa   :  { %s2652_s20 = scalar_lea.vmem %s26_s10, 64  ;;  %p2657_p4 = scmp.lt.s32.totalorder %s26_s10, %s26_s10 }
   0xb   :  { %p2653_p3 = scmp.ne.s32.totalorder %s26_s10, %s2652_s20  ;;  %p2658_p5 = scmp.lt.s32.totalorder %s2652_s20, %s2652_s20 }
   0xd   :  { %p2659_p6 = por %p2658_p5, %p2657_p4 }
   0xf   :  { %p2660_p7 = pnand %p2659_p6, %p2653_p3 }
  0x11   :  { %2663 = shalt.err (!%p2660_p7)
}
  0x12   :  { %28 = dma.hbm_to_vmem [thread:$0]  %s3185_s1, 64, %s26_s10, [#allocation3]  }
  0x13   :  { %s2664_s25 = scalar_lea.hbm %s3189_s5, 512 }
  0x14   :  { %p2665_p8 = scmp.ne.s32.totalorder %s3189_s5, %s2664_s25  ;;  %p2668_p9 = scmp.lt.u32.totalorder %s2664_s25, %s3189_s5 }
  0x16   :  { %p2670_p10 = pnand %p2668_p9, %p2665_p8 }
  0x18   :  { %2673 = shalt.err (!%p2670_p10)
}
  0x19   :  { %s2674_s30 = scalar_lea.vmem %s2774_s12, 512  ;;  %p2679_p12 = scmp.lt.s32.totalorder %s2774_s12, %s2774_s12 }
  0x1a   :  { %p2675_p11 = scmp.ne.s32.totalorder %s2774_s12, %s2674_s30  ;;  %p2680_p13 = scmp.lt.s32.totalorder %s2674_s30, %s2674_s30 }
  0x1c   :  { %p2681_p0 = por %p2680_p13, %p2679_p12 }
  0x1e   :  { %p2682_p1 = pnand %p2681_p0, %p2675_p11 }
  0x20   :  { %2685 = shalt.err (!%p2682_p1)
}
  0x21   :  { %s2716_s1 = smov 128   ;;  %s2717_s10 = smov 8  }
  0x22   :  { %46 = dma.hbm_to_vmem [thread:$0]  %s3189_s5, 512, %s2774_s12, [#allocation6], %s2716_s1, %s2716_s1, %s2717_s10  }
  0x23   :  { %2708 = dma.done.wait [#allocation3], 64  }
  0x24   :  { %2709 = vsyncadd [#allocation3], 4294967232 }
  0x25   :  { %2710 = dma.done.wait [#allocation6], 512  }
  0x26   :  { %2711 = vsyncadd [#allocation6], 4294966784  ;;  %v2718_v0 = vmov 0.0|0.0   ;;  %vm2719_vm0 = vmmov 0   ;;  %v2720_v1 = vmov 0.0   ;;  %vm76_vm1 = vcmask 1043456  }
  0x27   :  { %2354 = vmatprep.subr.bf16.mxu1 %v2718_v0  ;;  %2111 = vmatprep.mubr.msk.f32.mxu1 %vm2719_vm0, %v2720_v1  ;;  %vm69_vm2 = vcmask 31744   ;;  %v61_v2 = vld [vmem:[#allocation2] sm:$0xf]  ;;  %v59_v3 = vld [vmem:[%s3184_s0] sm:$0xff]  ;;  %v60_v4 = vld [vmem:[%s3184_s0 + $0x8] sm:$0xff]  ;;  %vm177_vm3 = vcmask 1040384  }
  0x28   :  { %2098 = vmatprep.subr.msk.mxu0 %vm76_vm1, %v61_v2  ;;  %2100 = vmatprep.mubr.msk.f32.mxu0 %vm69_vm2, %v59_v3  ;;  %v170_v5 = vld [vmem:[%s3186_s2] sm:$0xff]  ;;  %v171_v6 = vld [vmem:[%s3186_s2 + $0x8] sm:$0xff]  ;;  %v172_v7 = vld [vmem:[%s3186_s2 + $0x10] sm:$0xff]  ;;  %s2722_s24 = smov 32   ;;  %vm179_vm4 = vcmask 261120   ;;  %vm283_vm5 = vcmask 523264  }
  0x29   :  { %2099 = vmatpush3.msk.msra.mxu0 %vm76_vm1, %v61_v2  ;;  %v2823_v8 = vpack.c.bf16 %v171_v6, %v170_v5  ;;  %v173_v9 = vld [vmem:[%s3186_s2 + $0x18] sm:$0xff]  ;;  %v1940_v11 = vld [vmem:[%s3187_s3] ss:$0 sm:$0xff]  ;;  %s2721_s3 = smov 64   ;;  %v156_v52 = vld [vmem:[%s3188_s4 + $0x8] sm:$0xff]  ;;  %vm1922_vm6 = vcmask 58368  }
  0x2a   :  { %2101 = vmatmul.mubr.msk.f32.vlgmr.msra.gmra.mrb[0].mxu0 %vm69_vm2, %v60_v4  ;;  %2360 = vmatprep.subr.bf16.mxu0 %v2718_v0  ;;  %v2830_v10 = vpack.c.bf16 %v173_v9, %v172_v7  ;;  %v155_v51 = vld [vmem:[%s3188_s4] sm:$0xff]  ;;  %v157_v53 = vld [vmem:[%s3188_s4 + $0x10] sm:$0xff]  ;;  %v158_v55 = vld [vmem:[%s3188_s4 + $0x18] sm:$0xff] }
  0x2b   :  { %2356 = vmatpush3.bf16.msra.mxu1 %v2823_v8  ;;  %2130 = vmatprep.mubr.msk.f32.mxu0 %vm2719_vm0, %v2720_v1  ;;  %v2883_v54 = vpack.c.bf16 %v156_v52, %v155_v51  ;;  %v2889_v56 = vpack.c.bf16 %v158_v55, %v157_v53  ;;  %v159_v57 = vld [vmem:[#allocation5] sm:$0xff]  ;;  %v160_v58 = vld [vmem:[#allocation5 + $0x8] sm:$0xff]  ;;  %v161_v60 = vld [vmem:[#allocation5 + $0x10] sm:$0xff] }
  0x2c   :  { %2357 = vmatprep.subr.bf16.mxu1 %v2718_v0  ;;  %v2893_v59 = vpack.c.bf16 %v160_v58, %v159_v57  ;;  %v162_v61 = vld [vmem:[#allocation5 + $0x18] sm:$0xff]  ;;  %v2926_v6 = vld [vmem:[%s3190_s6] ss:$0 sm:$0xff] }
  0x2d   :  { %2362 = vmatpush3.bf16.msra.mxu0 %v2883_v54  ;;  %v2898_v63 = vpack.c.bf16 %v162_v61, %v161_v60 }
  0x2e   :  { %2363 = vmatprep.subr.bf16.mxu0 %v2718_v0 }
  0x2f   :  { %2359 = vmatpush3.bf16.msra.mxu1 %v2830_v10 }
  0x30   :  { %2372 = vmatprep.subr.bf16.mxu1 %v2718_v0 }
  0x31   :  { %2365 = vmatpush3.bf16.msra.mxu0 %v2889_v56 }
  0x32   :  { %2112 = vmatmul.mubr.f32.vlgmr.msra.gmra.mrb[0].mxu1 %v2720_v1  ;;  %2366 = vmatprep.subr.bf16.mxu0 %v2718_v0 }
  0x33   :  { %2374 = vmatpush3.bf16.msra.mxu1 %v2823_v8  ;;  %2141 = vmatprep.mubr.msk.f32.mxu1 %vm2719_vm0, %v2720_v1 }
  0x34   :  { %2375 = vmatprep.subr.bf16.mxu1 %v2718_v0 }
  0x35   :  { %2368 = vmatpush3.bf16.msra.mxu0 %v2893_v59 }
  0x36   :  { %2369 = vmatprep.subr.bf16.mxu0 %v2718_v0 }
  0x37   :  { %2377 = vmatpush3.bf16.msra.mxu1 %v2830_v10 }
  0x38   :  { %2378 = vmatprep.subr.bf16.mxu1 %v2718_v0 }
  0x39   :  { %2371 = vmatpush3.bf16.msra.mxu0 %v2898_v63 }
  0x3a   :  { %2390 = vmatprep.subr.bf16.mxu0 %v2718_v0 }
  0xfd   :  { %v2102_v12 = vpop.f32.mrb[0].mxu0 }
  0xfe   :  { %v152_v13 = vadd.f32 %v2102_v12, %v1940_v11  ;;  %v146_v14 = vpop.f32.mrb[1].mxu0 }
  0xff   :  { %v147_v15 = vadd.f32 %v1940_v11, %v146_v14 }
 0x100   :  { %v175_v16 = vrot.slane %v152_v13, 7  ;;  %v590_v17 = vrot.slane %v152_v13, 1  ;;  %v798_v18 = vrot.slane %v152_v13, 2  ;;  %v1006_v19 = vrot.slane %v152_v13, 3 }
 0x101   :  { %v382_v20 = vrot.slane %v147_v15, 1  ;;  %v588_v21 = vrot.slane %v147_v15, 2  ;;  %v796_v22 = vrot.slane %v147_v15, 3  ;;  %v1004_v23 = vrot.slane %v147_v15, 4 }
 0x102   :  { %v178_v24 = vsel %vm177_vm3, %v147_v15, %v175_v16  ;;  %v1212_v25 = vrot.slane %v147_v15, 5  ;;  %v1214_v26 = vrot.slane %v152_v13, 4  ;;  %v1420_v27 = vrot.slane %v147_v15, 6 }
 0x103   :  { %v2849_v28 = vsel %vm177_vm3, %v382_v20, %v152_v13  ;;  %v2852_v29 = vsel %vm177_vm3, %v588_v21, %v590_v17  ;;  %v2855_v30 = vsel %vm177_vm3, %v796_v22, %v798_v18  ;;  %v2858_v31 = vsel %vm177_vm3, %v1004_v23, %v1006_v19 }
 0x104   :  { %v2861_v32 = vsel %vm177_vm3, %v1212_v25, %v1214_v26  ;;  %v1422_v33 = vrot.slane %v152_v13, 5  ;;  %v1628_v34 = vrot.slane %v147_v15, 7  ;;  %v1630_v35 = vrot.slane %v152_v13, 6 }
 0x105   :  { %v249_v36 = vpop.f32.mrb[0].mxu1 }
 0x106   :  { %v253_v37 = vadd.f32 %v249_v36, %v178_v24  ;;  %v2113_v38 = vpop.f32.mrb[1].mxu1  ;;  %v2864_v39 = vsel %vm177_vm3, %v1420_v27, %v1422_v33  ;;  %v2867_v40 = vsel %vm177_vm3, %v1628_v34, %v1630_v35 }
 0x108   :  { %2514 = vtanh.f32 %v253_v37  ;;  %v1945_v42 = vmul.f32 -1.442695, %v253_v37 }
 0x10a   :  { %2516 = vpow2.f32 %v1945_v42 }
 0x112   :  { %v2515_v41 = vpop.eup %2514 }
 0x113   :  { %263 = vrot.lane.b32.xlu0 %v2515_v41, %s2721_s3 }
 0x114   :  { %v2517_v43 = vpop.eup %2516 }
 0x115   :  { %v257_v44 = vadd.f32 1.0, %v2517_v43 }
 0x117   :  { %2518 = vrcp.f32 %v257_v44 }
 0x121   :  { %v2519_v45 = vpop.eup %2518 }
 0x122   :  { %v261_v48 = vmul.f32 0.0, %v2519_v45 }
 0x185   :  { %v264_v46 = vpop.permute.xlu0 %263 }
 0x186   :  { %v266_v47 = vmul.f32 %v2519_v45, %v264_v46 }
 0x188   :  { %268 = vrot.lane.b32.xlu0 %v266_v47, %s2722_s24 }
 0x1fa   :  { %v269_v49 = vpop.permute.xlu0 %268 }
 0x1fb   :  { %v2871_v50 = vadd.f32 %v269_v49, %v261_v48 }
 0x1fd   :  { %2520 = vtanh.f32 %v2871_v50 }
 0x207   :  { %v2521_v62 = vpop.eup %2520 }
 0x208   :  { %274 = vrot.lane.b32.xlu1 %v2521_v62, %s2721_s3 }
 0x27a   :  { %v275_v2 = vpop.permute.xlu1 %274 }
 0x27b   :  { %v277_v3 = vmul.f32 %v2519_v45, %v275_v2 }
 0x27d   :  { %279 = vrot.lane.b32.xlu1 %v277_v3, %s2722_s24 }
 0x2ef   :  { %v280_v4 = vpop.permute.xlu1 %279 }
 0x2f0   :  { %v282_v5 = vsel %vm179_vm4, %v280_v4, 0.0  ;;  %2142 = vmatmul.mubr.msk.f32.vlgmr.msra.gmra.mrb[2].mxu1 %vm179_vm4, %v280_v4 }
 0x2f1   :  { %2131 = vmatmul.mubr.msk.f32.vlgmr.msra.gmra.mrb[2].mxu0 %vm283_vm5, %v282_v5  ;;  %2380 = vmatpush3.bf16.msra.mxu1 %v2883_v54 }
 0x2f2   :  { %2381 = vmatprep.subr.bf16.mxu1 %v2718_v0  ;;  %2392 = vmatpush3.bf16.msra.mxu0 %v2823_v8 }
 0x2f3   :  { %2393 = vmatprep.subr.bf16.mxu0 %v2718_v0  ;;  %2171 = vmatprep.mubr.msk.f32.mxu0 %vm2719_vm0, %v2720_v1 }
 0x2f4   :  { %2160 = vmatprep.mubr.msk.f32.mxu1 %vm2719_vm0, %v2720_v1 }
 0x2f5   :  { %2383 = vmatpush3.bf16.msra.mxu1 %v2889_v56 }
 0x2f6   :  { %2384 = vmatprep.subr.bf16.mxu1 %v2718_v0  ;;  %2395 = vmatpush3.bf16.msra.mxu0 %v2830_v10 }
 0x2f7   :  { %2396 = vmatprep.subr.bf16.mxu0 %v2718_v0 }
 0x2f9   :  { %2386 = vmatpush3.bf16.msra.mxu1 %v2893_v59 }
 0x2fa   :  { %2387 = vmatprep.subr.bf16.mxu1 %v2718_v0 }
 0x2fd   :  { %2389 = vmatpush3.bf16.msra.mxu1 %v2898_v63 }
 0x2fe   :  { %2408 = vmatprep.subr.bf16.mxu1 %v2718_v0 }
 0x3c3   :  { %v453_v7 = vpop.f32.mrb[2].mxu1 }
 0x3c4   :  { %v457_v9 = vadd.f32 %v453_v7, %v2849_v28  ;;  %v353_v11 = vpop.f32.mrb[2].mxu0  ;;  %v2143_v12 = vpop.f32.mrb[3].mxu1 }
 0x3c5   :  { %v354_v13 = vadd.f32 %v2926_v6, %v353_v11  ;;  %v2132_v14 = vpop.f32.mrb[3].mxu0 }
 0x3c6   :  { %2522 = vtanh.f32 %v457_v9  ;;  %v1949_v17 = vmul.f32 -1.442695, %v457_v9 }
 0x3c7   :  { %2524 = vtanh.f32 %v354_v13  ;;  %v1947_v18 = vmul.f32 -1.442695, %v354_v13 }
 0x3c8   :  { %2526 = vpow2.f32 %v1949_v17 }
 0x3c9   :  { %2528 = vpow2.f32 %v1947_v18 }
 0x3d0   :  { %v2523_v15 = vpop.eup %2522 }
 0x3d1   :  { %v2525_v16 = vpop.eup %2524  ;;  %467 = vrot.lane.b32.xlu1 %v2523_v15, %s2721_s3 }
 0x3d2   :  { %366 = vrot.lane.b32.xlu0 %v2525_v16, %s2721_s3  ;;  %v2527_v19 = vpop.eup %2526 }
 0x3d3   :  { %v2529_v20 = vpop.eup %2528  ;;  %v461_v21 = vadd.f32 1.0, %v2527_v19 }
 0x3d4   :  { %v360_v22 = vadd.f32 1.0, %v2529_v20 }
 0x3d5   :  { %2530 = vrcp.f32 %v461_v21 }
 0x3d6   :  { %2532 = vrcp.f32 %v360_v22 }
 0x3df   :  { %v2531_v23 = vpop.eup %2530 }
 0x3e0   :  { %v2533_v25 = vpop.eup %2532  ;;  %v465_v33 = vmul.f32 %v2531_v23, %v2871_v50 }
 0x3e1   :  { %v364_v35 = vmul.f32 0.0, %v2533_v25 }
 0x443   :  { %v468_v24 = vpop.permute.xlu1 %467 }
 0x444   :  { %v470_v26 = vmul.f32 %v2531_v23, %v468_v24  ;;  %v367_v27 = vpop.permute.xlu0 %366 }
 0x445   :  { %v369_v28 = vmul.f32 %v2533_v25, %v367_v27 }
 0x446   :  { %472 = vrot.lane.b32.xlu1 %v470_v26, %s2722_s24 }
 0x447   :  { %371 = vrot.lane.b32.xlu0 %v369_v28, %s2722_s24 }
 0x4b8   :  { %v473_v34 = vpop.permute.xlu1 %472 }
 0x4b9   :  { %v2935_v36 = vadd.f32 %v473_v34, %v465_v33  ;;  %v372_v37 = vpop.permute.xlu0 %371 }
 0x4ba   :  { %v2937_v38 = vadd.f32 %v372_v37, %v364_v35 }
 0x4bb   :  { %2534 = vtanh.f32 %v2935_v36 }
 0x4bc   :  { %2536 = vtanh.f32 %v2937_v38 }
 0x4c5   :  { %v2535_v41 = vpop.eup %2534 }
 0x4c6   :  { %v2537_v42 = vpop.eup %2536  ;;  %478 = vrot.lane.b32.xlu1 %v2535_v41, %s2721_s3 }
 0x4c7   :  { %377 = vrot.lane.b32.xlu0 %v2537_v42, %s2721_s3 }
 0x538   :  { %v479_v43 = vpop.permute.xlu1 %478 }
 0x539   :  { %v481_v44 = vmul.f32 %v2531_v23, %v479_v43  ;;  %v378_v45 = vpop.permute.xlu0 %377 }
 0x53a   :  { %v380_v46 = vmul.f32 %v2533_v25, %v378_v45 }
 0x53b   :  { %483 = vrot.lane.b32.xlu0 %v481_v44, %s2722_s24 }
 0x53c   :  { %487 = vrot.lane.b32.xlu1 %v380_v46, %s2721_s3 }
 0x5ad   :  { %v484_v47 = vpop.permute.xlu0 %483 }
 0x5ae   :  { %v488_v48 = vpop.permute.xlu1 %487  ;;  %2172 = vmatmul.mubr.msk.f32.vlgmr.msra.gmra.mrb[4].mxu0 %vm179_vm4, %v484_v47 }
 0x5af   :  { %v490_v49 = vsel %vm179_vm4, %v484_v47, %v488_v48  ;;  %2398 = vmatpush3.bf16.msra.mxu0 %v2883_v54  ;;  %2190 = vmatprep.mubr.msk.f32.mxu0 %vm2719_vm0, %v2720_v1 }
 0x5b0   :  { %2161 = vmatmul.mubr.msk.f32.vlgmr.msra.gmra.mrb[4].mxu1 %vm283_vm5, %v490_v49  ;;  %2399 = vmatprep.subr.bf16.mxu0 %v2718_v0 }
 0x5b1   :  { %2410 = vmatpush3.bf16.msra.mxu1 %v2823_v8  ;;  %2201 = vmatprep.mubr.msk.f32.mxu1 %vm2719_vm0, %v2720_v1 }
 0x5b2   :  { %2411 = vmatprep.subr.bf16.mxu1 %v2718_v0 }
 0x5b3   :  { %2401 = vmatpush3.bf16.msra.mxu0 %v2889_v56 }
 0x5b4   :  { %2402 = vmatprep.subr.bf16.mxu0 %v2718_v0 }
 0x5b5   :  { %2413 = vmatpush3.bf16.msra.mxu1 %v2830_v10 }
 0x5b6   :  { %2414 = vmatprep.subr.bf16.mxu1 %v2718_v0 }
 0x5b7   :  { %2404 = vmatpush3.bf16.msra.mxu0 %v2893_v59 }
 0x5b8   :  { %2405 = vmatprep.subr.bf16.mxu0 %v2718_v0 }
 0x5bb   :  { %2407 = vmatpush3.bf16.msra.mxu0 %v2898_v63 }
 0x5bc   :  { %2426 = vmatprep.subr.bf16.mxu0 %v2718_v0 }
 0x681   :  { %v661_v50 = vpop.f32.mrb[4].mxu0 }
 0x682   :  { %v665_v51 = vadd.f32 %v661_v50, %v2852_v29  ;;  %v2173_v52 = vpop.f32.mrb[5].mxu0 }
 0x683   :  { %v560_v53 = vpop.f32.mrb[4].mxu1 }
 0x684   :  { %2538 = vtanh.f32 %v665_v51  ;;  %v561_v55 = vadd.f32 %v2926_v6, %v560_v53  ;;  %v2162_v57 = vpop.f32.mrb[5].mxu1  ;;  %v1953_v61 = vmul.f32 -1.442695, %v665_v51 }
 0x686   :  { %2540 = vtanh.f32 %v561_v55  ;;  %v1951_v62 = vmul.f32 -1.442695, %v561_v55 }
 0x687   :  { %2542 = vpow2.f32 %v1953_v61 }
 0x688   :  { %2544 = vpow2.f32 %v1951_v62 }
 0x68e   :  { %v2539_v58 = vpop.eup %2538 }
 0x68f   :  { %675 = vrot.lane.b32.xlu1 %v2539_v58, %s2721_s3 }
 0x690   :  { %v2541_v60 = vpop.eup %2540 }
 0x691   :  { %573 = vrot.lane.b32.xlu0 %v2541_v60, %s2721_s3  ;;  %v2543_v2 = vpop.eup %2542 }
 0x692   :  { %v2545_v3 = vpop.eup %2544  ;;  %v669_v29 = vadd.f32 1.0, %v2543_v2 }
 0x693   :  { %v567_v4 = vadd.f32 1.0, %v2545_v3 }
 0x694   :  { %2546 = vrcp.f32 %v669_v29 }
 0x695   :  { %2548 = vrcp.f32 %v567_v4 }
 0x69e   :  { %v2547_v5 = vpop.eup %2546 }
 0x69f   :  { %v2549_v11 = vpop.eup %2548  ;;  %v673_v14 = vmul.f32 %v2547_v5, %v2935_v36 }
 0x6a0   :  { %v571_v17 = vmul.f32 %v2549_v11, %v2937_v38 }
 0x701   :  { %v676_v7 = vpop.permute.xlu1 %675 }
 0x702   :  { %v678_v9 = vmul.f32 %v2547_v5, %v676_v7 }
 0x703   :  { %v574_v12 = vpop.permute.xlu0 %573 }
 0x704   :  { %680 = vrot.lane.b32.xlu1 %v678_v9, %s2722_s24  ;;  %v576_v13 = vmul.f32 %v2549_v11, %v574_v12 }
 0x706   :  { %578 = vrot.lane.b32.xlu0 %v576_v13, %s2722_s24 }
 0x776   :  { %v681_v15 = vpop.permute.xlu1 %680 }
 0x777   :  { %v2971_v16 = vadd.f32 %v681_v15, %v673_v14 }
 0x778   :  { %v579_v18 = vpop.permute.xlu0 %578 }
 0x779   :  { %2550 = vtanh.f32 %v2971_v16  ;;  %v2975_v19 = vadd.f32 %v579_v18, %v571_v17 }
 0x77b   :  { %2552 = vtanh.f32 %v2975_v19 }
 0x783   :  { %v2551_v20 = vpop.eup %2550 }
 0x784   :  { %686 = vrot.lane.b32.xlu1 %v2551_v20, %s2721_s3 }
 0x785   :  { %v2553_v21 = vpop.eup %2552 }
 0x786   :  { %584 = vrot.lane.b32.xlu0 %v2553_v21, %s2721_s3 }
 0x7f6   :  { %v687_v22 = vpop.permute.xlu1 %686 }
 0x7f7   :  { %v689_v23 = vmul.f32 %v2547_v5, %v687_v22 }
 0x7f8   :  { %v585_v24 = vpop.permute.xlu0 %584 }
 0x7f9   :  { %691 = vrot.lane.b32.xlu0 %v689_v23, %s2722_s24  ;;  %v587_v25 = vmul.f32 %v2549_v11, %v585_v24 }
 0x7fb   :  { %695 = vrot.lane.b32.xlu1 %v587_v25, %s2721_s3 }
 0x86b   :  { %v692_v26 = vpop.permute.xlu0 %691 }
 0x86c   :  { %2202 = vmatmul.mubr.msk.f32.vlgmr.msra.gmra.mrb[6].mxu1 %vm179_vm4, %v692_v26 }
 0x86d   :  { %2416 = vmatpush3.bf16.msra.mxu1 %v2883_v54  ;;  %2220 = vmatprep.mubr.msk.f32.mxu1 %vm2719_vm0, %v2720_v1  ;;  %v696_v27 = vpop.permute.xlu1 %695 }
 0x86e   :  { %2417 = vmatprep.subr.bf16.mxu1 %v2718_v0  ;;  %v698_v28 = vsel %vm179_vm4, %v692_v26, %v696_v27 }
 0x86f   :  { %2191 = vmatmul.mubr.msk.f32.vlgmr.msra.gmra.mrb[6].mxu0 %vm283_vm5, %v698_v28 }
 0x870   :  { %2428 = vmatpush3.bf16.msra.mxu0 %v2823_v8  ;;  %2231 = vmatprep.mubr.msk.f32.mxu0 %vm2719_vm0, %v2720_v1 }
 0x871   :  { %2419 = vmatpush3.bf16.msra.mxu1 %v2889_v56  ;;  %2429 = vmatprep.subr.bf16.mxu0 %v2718_v0 }
 0x872   :  { %2420 = vmatprep.subr.bf16.mxu1 %v2718_v0 }
 0x874   :  { %2431 = vmatpush3.bf16.msra.mxu0 %v2830_v10 }
 0x875   :  { %2422 = vmatpush3.bf16.msra.mxu1 %v2893_v59  ;;  %2432 = vmatprep.subr.bf16.mxu0 %v2718_v0 }
 0x876   :  { %2423 = vmatprep.subr.bf16.mxu1 %v2718_v0 }
 0x879   :  { %2425 = vmatpush3.bf16.msra.mxu1 %v2898_v63 }
 0x87a   :  { %2444 = vmatprep.subr.bf16.mxu1 %v2718_v0 }
 0x93f   :  { %v869_v33 = vpop.f32.mrb[6].mxu1 }
 0x940   :  { %v873_v34 = vadd.f32 %v869_v33, %v2855_v30  ;;  %v2203_v35 = vpop.f32.mrb[7].mxu1 }
 0x942   :  { %2554 = vtanh.f32 %v873_v34  ;;  %v768_v36 = vpop.f32.mrb[6].mxu0  ;;  %v1957_v43 = vmul.f32 -1.442695, %v873_v34 }
 0x943   :  { %v769_v37 = vadd.f32 %v2926_v6, %v768_v36  ;;  %v2192_v38 = vpop.f32.mrb[7].mxu0 }
 0x945   :  { %2556 = vtanh.f32 %v769_v37  ;;  %v1955_v44 = vmul.f32 -1.442695, %v769_v37 }
 0x946   :  { %2558 = vpow2.f32 %v1957_v43 }
 0x947   :  { %2560 = vpow2.f32 %v1955_v44 }
 0x94c   :  { %v2555_v41 = vpop.eup %2554 }
 0x94d   :  { %883 = vrot.lane.b32.xlu1 %v2555_v41, %s2721_s3 }
 0x94f   :  { %v2557_v42 = vpop.eup %2556 }
 0x950   :  { %781 = vrot.lane.b32.xlu0 %v2557_v42, %s2721_s3  ;;  %v2559_v45 = vpop.eup %2558 }
 0x951   :  { %v877_v46 = vadd.f32 1.0, %v2559_v45  ;;  %v2561_v30 = vpop.eup %2560 }
 0x952   :  { %v775_v47 = vadd.f32 1.0, %v2561_v30 }
 0x953   :  { %2562 = vrcp.f32 %v877_v46 }
 0x954   :  { %2564 = vrcp.f32 %v775_v47 }
 0x95d   :  { %v2563_v48 = vpop.eup %2562 }
 0x95e   :  { %v2565_v51 = vpop.eup %2564  ;;  %v881_v55 = vmul.f32 %v2563_v48, %v2971_v16 }
 0x95f   :  { %v779_v60 = vmul.f32 %v2565_v51, %v2975_v19 }
 0x9bf   :  { %v884_v49 = vpop.permute.xlu1 %883 }
 0x9c0   :  { %v886_v50 = vmul.f32 %v2563_v48, %v884_v49 }
 0x9c2   :  { %888 = vrot.lane.b32.xlu1 %v886_v50, %s2722_s24  ;;  %v782_v52 = vpop.permute.xlu0 %781 }
 0x9c3   :  { %v784_v53 = vmul.f32 %v2565_v51, %v782_v52 }
 0x9c5   :  { %786 = vrot.lane.b32.xlu0 %v784_v53, %s2722_s24 }
 0xa34   :  { %v889_v57 = vpop.permute.xlu1 %888 }
 0xa35   :  { %v3008_v58 = vadd.f32 %v889_v57, %v881_v55 }
 0xa37   :  { %2566 = vtanh.f32 %v3008_v58  ;;  %v787_v61 = vpop.permute.xlu0 %786 }
 0xa38   :  { %v3012_v62 = vadd.f32 %v787_v61, %v779_v60 }
 0xa3a   :  { %2568 = vtanh.f32 %v3012_v62 }
 0xa41   :  { %v2567_v2 = vpop.eup %2566 }
 0xa42   :  { %894 = vrot.lane.b32.xlu1 %v2567_v2, %s2721_s3 }
 0xa44   :  { %v2569_v3 = vpop.eup %2568 }
 0xa45   :  { %792 = vrot.lane.b32.xlu0 %v2569_v3, %s2721_s3 }
 0xab4   :  { %v895_v29 = vpop.permute.xlu1 %894 }
 0xab5   :  { %v897_v4 = vmul.f32 %v2563_v48, %v895_v29 }
 0xab7   :  { %899 = vrot.lane.b32.xlu0 %v897_v4, %s2722_s24  ;;  %v793_v5 = vpop.permute.xlu0 %792 }
 0xab8   :  { %v795_v7 = vmul.f32 %v2565_v51, %v793_v5 }
 0xaba   :  { %903 = vrot.lane.b32.xlu1 %v795_v7, %s2721_s3 }
 0xb29   :  { %v900_v9 = vpop.permute.xlu0 %899 }
 0xb2a   :  { %2232 = vmatmul.mubr.msk.f32.vlgmr.msra.gmra.mrb[8].mxu0 %vm179_vm4, %v900_v9 }
 0xb2b   :  { %2434 = vmatpush3.bf16.msra.mxu0 %v2883_v54  ;;  %2250 = vmatprep.mubr.msk.f32.mxu0 %vm2719_vm0, %v2720_v1 }
 0xb2c   :  { %2435 = vmatprep.subr.bf16.mxu0 %v2718_v0  ;;  %v904_v11 = vpop.permute.xlu1 %903 }
 0xb2d   :  { %v906_v12 = vsel %vm179_vm4, %v900_v9, %v904_v11 }
 0xb2e   :  { %2221 = vmatmul.mubr.msk.f32.vlgmr.msra.gmra.mrb[8].mxu1 %vm283_vm5, %v906_v12 }
 0xb2f   :  { %2437 = vmatpush3.bf16.msra.mxu0 %v2889_v56  ;;  %2446 = vmatpush3.bf16.msra.mxu1 %v2823_v8 }
 0xb30   :  { %2438 = vmatprep.subr.bf16.mxu0 %v2718_v0  ;;  %2447 = vmatprep.subr.bf16.mxu1 %v2718_v0 }
 0xb31   :  { %2261 = vmatprep.mubr.msk.f32.mxu1 %vm2719_vm0, %v2720_v1 }
 0xb33   :  { %2440 = vmatpush3.bf16.msra.mxu0 %v2893_v59  ;;  %2449 = vmatpush3.bf16.msra.mxu1 %v2830_v10 }
 0xb34   :  { %2441 = vmatprep.subr.bf16.mxu0 %v2718_v0  ;;  %2450 = vmatprep.subr.bf16.mxu1 %v2718_v0 }
 0xb37   :  { %2443 = vmatpush3.bf16.msra.mxu0 %v2898_v63 }
 0xb38   :  { %2462 = vmatprep.subr.bf16.mxu0 %v2718_v0 }
 0xbfd   :  { %v1077_v13 = vpop.f32.mrb[8].mxu0 }
 0xbfe   :  { %v1081_v14 = vadd.f32 %v1077_v13, %v2858_v31  ;;  %v2233_v15 = vpop.f32.mrb[9].mxu0 }
 0xc00   :  { %2570 = vtanh.f32 %v1081_v14  ;;  %v1961_v21 = vmul.f32 -1.442695, %v1081_v14 }
 0xc01   :  { %v976_v16 = vpop.f32.mrb[8].mxu1 }
 0xc02   :  { %v977_v17 = vadd.f32 %v2926_v6, %v976_v16  ;;  %v2222_v18 = vpop.f32.mrb[9].mxu1 }
 0xc04   :  { %2572 = vtanh.f32 %v977_v17  ;;  %v1959_v22 = vmul.f32 -1.442695, %v977_v17 }
 0xc05   :  { %2574 = vpow2.f32 %v1961_v21 }
 0xc06   :  { %2576 = vpow2.f32 %v1959_v22 }
 0xc0a   :  { %v2571_v19 = vpop.eup %2570 }
 0xc0b   :  { %1091 = vrot.lane.b32.xlu1 %v2571_v19, %s2721_s3 }
 0xc0e   :  { %v2573_v20 = vpop.eup %2572 }
 0xc0f   :  { %989 = vrot.lane.b32.xlu0 %v2573_v20, %s2721_s3  ;;  %v2575_v23 = vpop.eup %2574 }
 0xc10   :  { %v1085_v24 = vadd.f32 1.0, %v2575_v23  ;;  %v2577_v31 = vpop.eup %2576 }
 0xc11   :  { %v983_v25 = vadd.f32 1.0, %v2577_v31 }
 0xc12   :  { %2578 = vrcp.f32 %v1085_v24 }
 0xc13   :  { %2580 = vrcp.f32 %v983_v25 }
 0xc1c   :  { %v2579_v26 = vpop.eup %2578 }
 0xc1d   :  { %v2581_v33 = vpop.eup %2580  ;;  %v1089_v36 = vmul.f32 %v2579_v26, %v3008_v58 }
 0xc1e   :  { %v987_v41 = vmul.f32 %v2581_v33, %v3012_v62 }
 0xc7d   :  { %v1092_v27 = vpop.permute.xlu1 %1091 }
 0xc7e   :  { %v1094_v28 = vmul.f32 %v2579_v26, %v1092_v27 }
 0xc80   :  { %1096 = vrot.lane.b32.xlu1 %v1094_v28, %s2722_s24 }
 0xc81   :  { %v990_v34 = vpop.permute.xlu0 %989 }
 0xc82   :  { %v992_v35 = vmul.f32 %v2581_v33, %v990_v34 }
 0xc84   :  { %994 = vrot.lane.b32.xlu0 %v992_v35, %s2722_s24 }
 0xcf2   :  { %v1097_v37 = vpop.permute.xlu1 %1096 }
 0xcf3   :  { %v3045_v38 = vadd.f32 %v1097_v37, %v1089_v36 }
 0xcf5   :  { %2582 = vtanh.f32 %v3045_v38 }
 0xcf6   :  { %v995_v42 = vpop.permute.xlu0 %994 }
 0xcf7   :  { %v3049_v43 = vadd.f32 %v995_v42, %v987_v41 }
 0xcf9   :  { %2584 = vtanh.f32 %v3049_v43 }
 0xcff   :  { %v2583_v44 = vpop.eup %2582 }
 0xd00   :  { %1102 = vrot.lane.b32.xlu1 %v2583_v44, %s2721_s3 }
 0xd03   :  { %v2585_v45 = vpop.eup %2584 }
 0xd04   :  { %1000 = vrot.lane.b32.xlu0 %v2585_v45, %s2721_s3 }
 0xd72   :  { %v1103_v46 = vpop.permute.xlu1 %1102 }
 0xd73   :  { %v1105_v30 = vmul.f32 %v2579_v26, %v1103_v46 }
 0xd75   :  { %1107 = vrot.lane.b32.xlu0 %v1105_v30, %s2722_s24 }
 0xd76   :  { %v1001_v47 = vpop.permute.xlu0 %1000 }
 0xd77   :  { %v1003_v48 = vmul.f32 %v2581_v33, %v1001_v47 }
 0xd79   :  { %1111 = vrot.lane.b32.xlu1 %v1003_v48, %s2721_s3 }
 0xde7   :  { %v1108_v49 = vpop.permute.xlu0 %1107 }
 0xde8   :  { %2262 = vmatmul.mubr.msk.f32.vlgmr.msra.gmra.mrb[10].mxu1 %vm179_vm4, %v1108_v49 }
 0xde9   :  { %2452 = vmatpush3.bf16.msra.mxu1 %v2883_v54  ;;  %2280 = vmatprep.mubr.msk.f32.mxu1 %vm2719_vm0, %v2720_v1 }
 0xdea   :  { %2453 = vmatprep.subr.bf16.mxu1 %v2718_v0 }
 0xdeb   :  { %v1112_v50 = vpop.permute.xlu1 %1111 }
 0xdec   :  { %v1114_v51 = vsel %vm179_vm4, %v1108_v49, %v1112_v50 }
 0xded   :  { %2455 = vmatpush3.bf16.msra.mxu1 %v2889_v56  ;;  %2251 = vmatmul.mubr.msk.f32.vlgmr.msra.gmra.mrb[10].mxu0 %vm283_vm5, %v1114_v51 }
 0xdee   :  { %2456 = vmatprep.subr.bf16.mxu1 %v2718_v0  ;;  %2464 = vmatpush3.bf16.msra.mxu0 %v2823_v8 }
 0xdef   :  { %2291 = vmatprep.mubr.msk.f32.mxu0 %vm2719_vm0, %v2720_v1  ;;  %2465 = vmatprep.subr.bf16.mxu0 %v2718_v0 }
 0xdf1   :  { %2458 = vmatpush3.bf16.msra.mxu1 %v2893_v59 }
 0xdf2   :  { %2459 = vmatprep.subr.bf16.mxu1 %v2718_v0  ;;  %2467 = vmatpush3.bf16.msra.mxu0 %v2830_v10 }
 0xdf3   :  { %2468 = vmatprep.subr.bf16.mxu0 %v2718_v0 }
 0xdf5   :  { %2461 = vmatpush3.bf16.msra.mxu1 %v2898_v63 }
 0xdf6   :  { %2480 = vmatprep.subr.bf16.mxu1 %v2718_v0 }
 0xebb   :  { %v1285_v52 = vpop.f32.mrb[10].mxu1 }
 0xebc   :  { %v1289_v53 = vadd.f32 %v1285_v52, %v2861_v32  ;;  %v2263_v55 = vpop.f32.mrb[11].mxu1 }
 0xebe   :  { %2586 = vtanh.f32 %v1289_v53  ;;  %v1965_v2 = vmul.f32 -1.442695, %v1289_v53 }
 0xec0   :  { %v1184_v57 = vpop.f32.mrb[10].mxu0 }
 0xec1   :  { %v1185_v58 = vadd.f32 %v2926_v6, %v1184_v57  ;;  %v2252_v60 = vpop.f32.mrb[11].mxu0 }
 0xec3   :  { %2588 = vtanh.f32 %v1185_v58  ;;  %v1963_v3 = vmul.f32 -1.442695, %v1185_v58 }
 0xec4   :  { %2590 = vpow2.f32 %v1965_v2 }
 0xec5   :  { %2592 = vpow2.f32 %v1963_v3 }
 0xec8   :  { %v2587_v61 = vpop.eup %2586 }
 0xec9   :  { %1299 = vrot.lane.b32.xlu1 %v2587_v61, %s2721_s3 }
 0xecd   :  { %v2589_v62 = vpop.eup %2588 }
 0xece   :  { %1197 = vrot.lane.b32.xlu0 %v2589_v62, %s2721_s3  ;;  %v2591_v29 = vpop.eup %2590 }
 0xecf   :  { %v1293_v4 = vadd.f32 1.0, %v2591_v29  ;;  %v2593_v32 = vpop.eup %2592 }
 0xed0   :  { %v1191_v5 = vadd.f32 1.0, %v2593_v32 }
 0xed1   :  { %2594 = vrcp.f32 %v1293_v4 }
 0xed2   :  { %2596 = vrcp.f32 %v1191_v5 }
 0xedb   :  { %v2595_v7 = vpop.eup %2594 }
 0xedc   :  { %v2597_v12 = vpop.eup %2596  ;;  %v1297_v15 = vmul.f32 %v2595_v7, %v3045_v38 }
 0xedd   :  { %v1195_v18 = vmul.f32 %v2597_v12, %v3049_v43 }
 0xf3b   :  { %v1300_v9 = vpop.permute.xlu1 %1299 }
 0xf3c   :  { %v1302_v11 = vmul.f32 %v2595_v7, %v1300_v9 }
 0xf3e   :  { %1304 = vrot.lane.b32.xlu1 %v1302_v11, %s2722_s24 }
 0xf40   :  { %v1198_v13 = vpop.permute.xlu0 %1197 }
 0xf41   :  { %v1200_v14 = vmul.f32 %v2597_v12, %v1198_v13 }
 0xf43   :  { %1202 = vrot.lane.b32.xlu0 %v1200_v14, %s2722_s24 }
 0xfb0   :  { %v1305_v16 = vpop.permute.xlu1 %1304 }
 0xfb1   :  { %v3082_v17 = vadd.f32 %v1305_v16, %v1297_v15 }
 0xfb3   :  { %2598 = vtanh.f32 %v3082_v17 }
 0xfb5   :  { %v1203_v19 = vpop.permute.xlu0 %1202 }
 0xfb6   :  { %v3086_v20 = vadd.f32 %v1203_v19, %v1195_v18 }
 0xfb8   :  { %2600 = vtanh.f32 %v3086_v20 }
 0xfbd   :  { %v2599_v21 = vpop.eup %2598 }
 0xfbe   :  { %1310 = vrot.lane.b32.xlu1 %v2599_v21, %s2721_s3 }
 0xfc2   :  { %v2601_v22 = vpop.eup %2600 }
 0xfc3   :  { %1208 = vrot.lane.b32.xlu0 %v2601_v22, %s2721_s3 }
0x1030   :  { %v1311_v23 = vpop.permute.xlu1 %1310 }
0x1031   :  { %v1313_v24 = vmul.f32 %v2595_v7, %v1311_v23 }
0x1033   :  { %1315 = vrot.lane.b32.xlu0 %v1313_v24, %s2722_s24 }
0x1035   :  { %v1209_v31 = vpop.permute.xlu0 %1208 }
0x1036   :  { %v1211_v25 = vmul.f32 %v2597_v12, %v1209_v31 }
0x1038   :  { %1319 = vrot.lane.b32.xlu1 %v1211_v25, %s2721_s3 }
0x10a5   :  { %v1316_v26 = vpop.permute.xlu0 %1315 }
0x10a6   :  { %2292 = vmatmul.mubr.msk.f32.vlgmr.msra.gmra.mrb[12].mxu0 %vm179_vm4, %v1316_v26 }
0x10a7   :  { %2470 = vmatpush3.bf16.msra.mxu0 %v2883_v54  ;;  %2310 = vmatprep.mubr.msk.f32.mxu0 %vm2719_vm0, %v2720_v1 }
0x10a8   :  { %2471 = vmatprep.subr.bf16.mxu0 %v2718_v0 }
0x10aa   :  { %v1320_v27 = vpop.permute.xlu1 %1319 }
0x10ab   :  { %2473 = vmatpush3.bf16.msra.mxu0 %v2889_v56  ;;  %v1322_v28 = vsel %vm179_vm4, %v1316_v26, %v1320_v27 }
0x10ac   :  { %2474 = vmatprep.subr.bf16.mxu0 %v2718_v0  ;;  %2281 = vmatmul.mubr.msk.f32.vlgmr.msra.gmra.mrb[12].mxu1 %vm283_vm5, %v1322_v28 }
0x10ad   :  { %2482 = vmatpush3.bf16.msra.mxu1 %v2823_v8  ;;  %2321 = vmatprep.mubr.msk.f32.mxu1 %vm2719_vm0, %v2720_v1 }
0x10ae   :  { %2483 = vmatprep.subr.bf16.mxu1 %v2718_v0 }
0x10af   :  { %2476 = vmatpush3.bf16.msra.mxu0 %v2893_v59 }
0x10b0   :  { %2477 = vmatprep.subr.bf16.mxu0 %v2718_v0 }
0x10b1   :  { %2485 = vmatpush3.bf16.msra.mxu1 %v2830_v10 }
0x10b2   :  { %2486 = vmatprep.subr.bf16.mxu1 %v2718_v0 }
0x10b3   :  { %2479 = vmatpush3.bf16.msra.mxu0 %v2898_v63 }
0x10b4   :  { %2498 = vmatprep.subr.bf16.mxu0 %v2718_v0 }
0x1179   :  { %v1493_v33 = vpop.f32.mrb[12].mxu0 }
0x117a   :  { %v1497_v8 = vadd.f32 %v1493_v33, %v2864_v39  ;;  %v2293_v34 = vpop.f32.mrb[13].mxu0 }
0x117c   :  { %2602 = vtanh.f32 %v1497_v8  ;;  %v1969_v41 = vmul.f32 -1.442695, %v1497_v8 }
0x117f   :  { %v1392_v35 = vpop.f32.mrb[12].mxu1 }
0x1180   :  { %v1393_v36 = vadd.f32 %v2926_v6, %v1392_v35  ;;  %v2282_v37 = vpop.f32.mrb[13].mxu1 }
0x1182   :  { %2604 = vtanh.f32 %v1393_v36  ;;  %v1967_v42 = vmul.f32 -1.442695, %v1393_v36 }
0x1183   :  { %2606 = vpow2.f32 %v1969_v41 }
0x1184   :  { %2608 = vpow2.f32 %v1967_v42 }
0x1186   :  { %v2603_v38 = vpop.eup %2602 }
0x1187   :  { %1507 = vrot.lane.b32.xlu1 %v2603_v38, %s2721_s3 }
0x118c   :  { %v2605_v10 = vpop.eup %2604 }
0x118d   :  { %1405 = vrot.lane.b32.xlu0 %v2605_v10, %s2721_s3  ;;  %v2607_v43 = vpop.eup %2606 }
0x118e   :  { %v1501_v44 = vadd.f32 1.0, %v2607_v43  ;;  %v2609_v39 = vpop.eup %2608 }
0x118f   :  { %v1399_v45 = vadd.f32 1.0, %v2609_v39 }
0x1190   :  { %2610 = vrcp.f32 %v1501_v44 }
0x1191   :  { %2612 = vrcp.f32 %v1399_v45 }
0x119a   :  { %v2611_v46 = vpop.eup %2610 }
0x119b   :  { %v2613_v48 = vpop.eup %2612  ;;  %v1505_v51 = vmul.f32 %v2611_v46, %v3082_v17 }
0x119c   :  { %v1403_v55 = vmul.f32 %v2613_v48, %v3086_v20 }
0x11f9   :  { %v1508_v30 = vpop.permute.xlu1 %1507 }
0x11fa   :  { %v1510_v47 = vmul.f32 %v2611_v46, %v1508_v30 }
0x11fc   :  { %1512 = vrot.lane.b32.xlu1 %v1510_v47, %s2722_s24 }
0x11ff   :  { %v1406_v49 = vpop.permute.xlu0 %1405 }
0x1200   :  { %v1408_v50 = vmul.f32 %v2613_v48, %v1406_v49 }
0x1202   :  { %1410 = vrot.lane.b32.xlu0 %v1408_v50, %s2722_s24 }
0x126e   :  { %v1513_v52 = vpop.permute.xlu1 %1512 }
0x126f   :  { %v1515_v53 = vadd.f32 %v1513_v52, %v1505_v51  ;;  %v1837_v52 = vld [vmem:[%s3191_s7 + $0x8] sm:$0xff] }
0x1271   :  { %2614 = vtanh.f32 %v1515_v53 }
0x1274   :  { %v1411_v57 = vpop.permute.xlu0 %1410 }
0x1275   :  { %v1413_v58 = vadd.f32 %v1411_v57, %v1403_v55  ;;  %v1839_v57 = vld [vmem:[%s3191_s7 + $0x18] sm:$0xff] }
0x1277   :  { %2616 = vtanh.f32 %v1413_v58 }
0x127b   :  { %v2615_v60 = vpop.eup %2614 }
0x127c   :  { %1518 = vrot.lane.b32.xlu1 %v2615_v60, %s2721_s3 }
0x1281   :  { %v2617_v61 = vpop.eup %2616 }
0x1282   :  { %1416 = vrot.lane.b32.xlu0 %v2617_v61, %s2721_s3 }
0x12ee   :  { %v1519_v62 = vpop.permute.xlu1 %1518 }
0x12ef   :  { %v1521_v2 = vmul.f32 %v2611_v46, %v1519_v62 }
0x12f1   :  { %1523 = vrot.lane.b32.xlu0 %v1521_v2, %s2722_s24 }
0x12f4   :  { %v1417_v3 = vpop.permute.xlu0 %1416 }
0x12f5   :  { %v1419_v29 = vmul.f32 %v2613_v48, %v1417_v3  ;;  %v1976_v3 = vld [vmem:[%s3192_s8] ss:$0 sm:$0xff] }
0x12f7   :  { %1527 = vrot.lane.b32.xlu1 %v1419_v29, %s2721_s3 }
0x1363   :  { %v1524_v4 = vpop.permute.xlu0 %1523 }
0x1364   :  { %2322 = vmatmul.mubr.msk.f32.vlgmr.msra.gmra.mrb[14].mxu1 %vm179_vm4, %v1524_v4 }
0x1365   :  { %2488 = vmatpush3.bf16.msra.mxu1 %v2883_v54  ;;  %2340 = vmatprep.mubr.msk.f32.mxu1 %vm2719_vm0, %v2720_v1 }
0x1366   :  { %2489 = vmatprep.subr.bf16.mxu1 %v2718_v0 }
0x1369   :  { %2491 = vmatpush3.bf16.msra.mxu1 %v2889_v56  ;;  %v1528_v32 = vpop.permute.xlu1 %1527 }
0x136a   :  { %2492 = vmatprep.subr.bf16.mxu1 %v2718_v0  ;;  %v1530_v5 = vsel %vm179_vm4, %v1524_v4, %v1528_v32 }
0x136b   :  { %2311 = vmatmul.mubr.msk.f32.vlgmr.msra.gmra.mrb[14].mxu0 %vm283_vm5, %v1530_v5 }
0x136c   :  { %2351 = vmatprep.mubr.msk.f32.mxu0 %vm2719_vm0, %v2720_v1 }
0x136d   :  { %2494 = vmatpush3.bf16.msra.mxu1 %v2893_v59 }
0x136e   :  { %2495 = vmatprep.subr.bf16.mxu1 %v2718_v0 }
0x1371   :  { %2497 = vmatpush3.bf16.msra.mxu1 %v2898_v63 }
0x1437   :  { %v1701_v54 = vpop.f32.mrb[14].mxu1 }
0x1438   :  { %v1705_v7 = vadd.f32 %v1701_v54, %v2867_v40  ;;  %v2323_v56 = vpop.f32.mrb[15].mxu1 }
0x143a   :  { %2618 = vtanh.f32 %v1705_v7  ;;  %v1973_v1 = vmul.f32 -1.442695, %v1705_v7 }
0x143e   :  { %v1600_v9 = vpop.f32.mrb[14].mxu0 }
0x143f   :  { %v1601_v11 = vadd.f32 %v2926_v6, %v1600_v9  ;;  %v2312_v12 = vpop.f32.mrb[15].mxu0 }
0x1441   :  { %2620 = vtanh.f32 %v1601_v11  ;;  %v1971_v14 = vmul.f32 -1.442695, %v1601_v11 }
0x1442   :  { %2622 = vpow2.f32 %v1973_v1 }
0x1443   :  { %2624 = vpow2.f32 %v1971_v14 }
0x1444   :  { %v2619_v13 = vpop.eup %2618 }
0x1445   :  { %1715 = vrot.lane.b32.xlu1 %v2619_v13, %s2721_s3 }
0x144b   :  { %v2621_v59 = vpop.eup %2620 }
0x144c   :  { %1613 = vrot.lane.b32.xlu0 %v2621_v59, %s2721_s3  ;;  %v2623_v63 = vpop.eup %2622 }
0x144d   :  { %v1709_v15 = vadd.f32 1.0, %v2623_v63  ;;  %v2625_v40 = vpop.eup %2624 }
0x144e   :  { %v1607_v16 = vadd.f32 1.0, %v2625_v40 }
0x144f   :  { %2626 = vrcp.f32 %v1709_v15 }
0x1450   :  { %2628 = vrcp.f32 %v1607_v16 }
0x1459   :  { %v2627_v17 = vpop.eup %2626 }
0x145a   :  { %v2629_v20 = vpop.eup %2628  ;;  %v1713_v23 = vmul.f32 %v2627_v17, %v1515_v53  ;;  %v1838_v53 = vld [vmem:[%s3191_s7 + $0x10] sm:$0xff] }
0x145b   :  { %v1611_v25 = vmul.f32 %v2629_v20, %v1413_v58  ;;  %v2502_v58 = vpack.c.bf16 %v1839_v57, %v1838_v53 }
0x14b7   :  { %v1716_v18 = vpop.permute.xlu1 %1715 }
0x14b8   :  { %v1718_v19 = vmul.f32 %v2627_v17, %v1716_v18 }
0x14ba   :  { %1720 = vrot.lane.b32.xlu1 %v1718_v19, %s2722_s24 }
0x14be   :  { %v1614_v21 = vpop.permute.xlu0 %1613 }
0x14bf   :  { %v1616_v22 = vmul.f32 %v2629_v20, %v1614_v21 }
0x14c1   :  { %1618 = vrot.lane.b32.xlu0 %v1616_v22, %s2722_s24 }
0x152c   :  { %v1721_v24 = vpop.permute.xlu1 %1720 }
0x152d   :  { %v1723_v31 = vadd.f32 %v1721_v24, %v1713_v23 }
0x152f   :  { %2630 = vtanh.f32 %v1723_v31 }
0x1533   :  { %v1619_v26 = vpop.permute.xlu0 %1618 }
0x1534   :  { %v1621_v27 = vadd.f32 %v1619_v26, %v1611_v25 }
0x1536   :  { %2632 = vtanh.f32 %v1621_v27 }
0x1539   :  { %v2631_v28 = vpop.eup %2630 }
0x153a   :  { %1726 = vrot.lane.b32.xlu1 %v2631_v28, %s2721_s3 }
0x1540   :  { %v2633_v33 = vpop.eup %2632 }
0x1541   :  { %1624 = vrot.lane.b32.xlu0 %v2633_v33, %s2721_s3 }
0x15ac   :  { %v1727_v8 = vpop.permute.xlu1 %1726 }
0x15ad   :  { %v1729_v34 = vmul.f32 %v2627_v17, %v1727_v8 }
0x15af   :  { %1731 = vrot.lane.b32.xlu0 %v1729_v34, %s2722_s24 }
0x15b3   :  { %v1625_v35 = vpop.permute.xlu0 %1624 }
0x15b4   :  { %v1627_v36 = vmul.f32 %v2629_v20, %v1625_v35 }
0x15b6   :  { %1735 = vrot.lane.b32.xlu1 %v1627_v36, %s2721_s3 }
0x1621   :  { %v1732_v37 = vpop.permute.xlu0 %1731 }
0x1628   :  { %v1736_v38 = vpop.permute.xlu1 %1735 }
0x1629   :  { %v1738_v10 = vsel %vm179_vm4, %v1732_v37, %v1736_v38 }
0x162a   :  { %2341 = vmatmul.mubr.msk.f32.vlgmr.msra.gmra.mrb[16].mxu1 %vm283_vm5, %v1738_v10 }
0x16fd   :  { %v1808_v41 = vpop.f32.mrb[16].mxu1 }
0x16fe   :  { %v1809_v42 = vadd.f32 %v2926_v6, %v1808_v41  ;;  %v2342_v43 = vpop.f32.mrb[17].mxu1  ;;  %v1836_v6 = vld [vmem:[%s3191_s7] sm:$0xff]  ;;  %s2723_s7 = smov [#allocation7]  }
0x16ff   :  { %v2499_v55 = vpack.c.bf16 %v1837_v52, %v1836_v6  ;;  %s1930_s20 = sshll.u32 %s2723_s7, 4  ;;  %s1931_s20 = int_to_ptr.vmem [resolvable:$true] %s1930_s20 }
0x1700   :  { %2634 = vtanh.f32 %v1809_v42  ;;  %v1975_v39 = vmul.f32 -1.442695, %v1809_v42  ;;  %s2686_s21 = scalar_lea.vmem %s1931_s20, 32  ;;  %p2691_p3 = scmp.lt.s32.totalorder %s1931_s20, %s1931_s20 }
0x1701   :  { %2500 = vmatpush3.bf16.msra.mxu0 %v2499_v55  ;;  %p2687_p2 = scmp.ne.s32.totalorder %s1931_s20, %s2686_s21  ;;  %p2692_p4 = scmp.lt.s32.totalorder %s2686_s21, %s2686_s21 }
0x1702   :  { %2636 = vpow2.f32 %v1975_v39  ;;  %2501 = vmatprep.subr.bf16.mxu0 %v2718_v0 }
0x1703   :  { %p2693_p5 = por %p2692_p4, %p2691_p3 }
0x1705   :  { %2503 = vmatpush3.bf16.msra.mxu0 %v2502_v58  ;;  %p2694_p6 = pnand %p2693_p5, %p2687_p2 }
0x170a   :  { %v2635_v44 = vpop.eup %2634 }
0x170b   :  { %1821 = vrot.lane.b32.xlu0 %v2635_v44, %s2721_s3 }
0x170c   :  { %v2637_v45 = vpop.eup %2636 }
0x170d   :  { %v1815_v46 = vadd.f32 1.0, %v2637_v45 }
0x170f   :  { %2638 = vrcp.f32 %v1815_v46 }
0x1719   :  { %v2639_v30 = vpop.eup %2638 }
0x171a   :  { %v1819_v49 = vmul.f32 %v2639_v30, %v1621_v27 }
0x177d   :  { %v1822_v47 = vpop.permute.xlu0 %1821 }
0x177e   :  { %v1824_v48 = vmul.f32 %v2639_v30, %v1822_v47 }
0x1780   :  { %1826 = vrot.lane.b32.xlu1 %v1824_v48, %s2722_s24 }
0x17f2   :  { %v1827_v50 = vpop.permute.xlu1 %1826 }
0x17f3   :  { %v1829_v51 = vadd.f32 %v1827_v50, %v1819_v49 }
0x17f5   :  { %2640 = vtanh.f32 %v1829_v51 }
0x17ff   :  { %v2641_v60 = vpop.eup %2640 }
0x1800   :  { %1832 = vrot.lane.b32.xlu0 %v2641_v60, %s2721_s3 }
0x1872   :  { %v1833_v61 = vpop.permute.xlu0 %1832 }
0x1873   :  { %v1835_v62 = vmul.f32 %v2639_v30, %v1833_v61 }
0x1875   :  { %1848 = vrot.lane.b32.xlu1 %v1835_v62, %s2722_s24 }
0x18e7   :  { %v1849_v2 = vpop.permute.xlu1 %1848 }
0x18e8   :  { %2352 = vmatmul.mubr.msk.f32.vlgmr.msra.gmra.mrb[16].mxu0 %vm179_vm4, %v1849_v2 }
0x19bb   :  { %v1918_v29 = vpop.f32.mrb[16].mxu0 }
0x19bc   :  { %v1919_v0 = vadd.f32 %v1976_v3, %v1918_v29  ;;  %v2353_v4 = vpop.f32.mrb[17].mxu0 }
0x19be   :  { %1923 = vst.msk [vmem:[#allocation7] sm:$0x3] %vm1922_vm6, %v1919_v0 }
0x19bf   :  { %2697 = shalt.err (!%p2694_p6)
}
0x19c0   :  { %s2698_s0 = scalar_lea.hbm %s3193_s9, 32 }
0x19c1   :  { %p2699_p7 = scmp.ne.s32.totalorder %s3193_s9, %s2698_s0  ;;  %p2702_p8 = scmp.lt.u32.totalorder %s2698_s0, %s3193_s9 }
0x19c3   :  { %p2704_p9 = pnand %p2702_p8, %p2699_p7 }
0x19c5   :  { %2707 = shalt.err (!%p2704_p9)
}
0x19c6   :  { %1933 = dma.vmem_to_hbm [thread:$0]  %s1931_s20, 32, %s3193_s9, [#allocation4]  }
0x19c7   :  { %2712 = dma.done.wait [#allocation4], 32  }
0x19c8   :  { %2713 = vsyncadd [#allocation4], 4294967264 }
0x19c9   :  { %1937 = vsyncpa [#allocation3], 1 }
0x19ca   :  { %1938 = vsyncpa [#allocation6], 1 }
0x19cb   :  { %1939 = vsyncpa [#allocation4], 1 }

</bundles_post_ra>
